<compile_context>
chip_gen: v6e
topology: v6e:2x2x1
jax: 0.10.0
libtpu: 0.0.40
codegen_flags: <defaults>
</compile_context>

<pallas_src>
import jax
import jax.numpy as jnp
from jax.experimental import pallas as pl
from jax.experimental.pallas import tpu as pltpu


def _round_up(n, m):
    return ((n + m - 1) // m) * m


def mlp_outer_kernel(x_ref, a_ref, d_ref, out_ref):
    # x_ref  : (tb, 8)     contiguous row-major batch tile (batch on sublanes)
    # a_ref  : (2, 8, 32)  folded weights [A1; A2], VMEM-resident
    # d_ref  : (2, 1, 32)  folded biases  [d1; d2], VMEM-resident
    # out_ref: (tb, 32)    flattened (4, 8) outer product per row; last dim is
    #                      the full extent -> contiguous HBM write
    x = x_ref[...]
    hi = jax.lax.Precision.HIGHEST
    u = jnp.dot(x, a_ref[0], preferred_element_type=jnp.float32, precision=hi) + d_ref[0]
    v = jnp.dot(x, a_ref[1], preferred_element_type=jnp.float32, precision=hi) + d_ref[1]
    out_ref[...] = u * v


def _forward_ref(x, w1, b1, w2, b2):
    """Pure-JAX reference of the same (outer-product-broadcast) semantics."""
    hi = jax.lax.Precision.HIGHEST
    n1 = jnp.dot(x, w1.T, precision=hi) + b1          # (B, 4)
    n2 = jnp.dot(n1, w2.T, precision=hi) + b2         # (B, 8)
    return n1[:, :, None] * n2[:, None, :]            # (B, 4, 8)


def model_forward(x, w1, b1, w2, b2, *, block_b=32768, min_pallas_batch=128):
    """x: (B, 8); w1: (4, 8); b1: (4,); w2: (8, 4); b2: (8,)  [PyTorch layouts].

    Returns (B, 4, 8) float32.
    """
    B = x.shape[0]

    # Tiny batches: a pallas_call is pure launch/DMA-setup overhead for a few
    # hundred FLOPs; let XLA fuse the two matmuls + outer product directly.
    if B < min_pallas_batch:
        return _forward_ref(x, w1, b1, w2, b2)

    hi = jax.lax.Precision.HIGHEST

    # Fold the dependent linear chain: n2 = x @ (W2 W1)^T + (W2 b1 + b2).
    w21 = jnp.dot(w2, w1, precision=hi)                # (8, 8)
    c2 = jnp.dot(w2, b1, precision=hi) + b2            # (8,)

    # Expansion matrices: u[:, 8i+j] = n1[:, i],  v[:, 8i+j] = n2[:, j].
    E = jnp.kron(jnp.eye(4, dtype=jnp.float32), jnp.ones((1, 8), jnp.float32))  # (4, 32)
    T = jnp.kron(jnp.ones((1, 4), jnp.float32), jnp.eye(8, dtype=jnp.float32))  # (8, 32)

    A = jnp.stack([jnp.dot(w1.T, E, precision=hi),      # A1: (8, 32)
                   jnp.dot(w21.T, T, precision=hi)])     # A2: (8, 32)
    D = jnp.stack([jnp.dot(b1, E, precision=hi),         # d1: (32,)
                   jnp.dot(c2, T, precision=hi)]).reshape(2, 1, 32)

    # Batch tile: multiple of 128 rows, sized so the grid has ~8 steps (overlap
    # of output writeback with next input fetch; both TCs busy on v7x), capped
    # at block_b.  Double-buffered footprint at tb = 32768 is ~10 MiB.
    tb = min(int(block_b), _round_up(pl.cdiv(B, 8), 128))
    tb = _round_up(max(tb, 128), 128)
    grid = (pl.cdiv(B, tb),)

    out2d = pl.pallas_call(
        mlp_outer_kernel,
        out_shape=jax.ShapeDtypeStruct((B, 32), jnp.float32),
        grid=grid,
        in_specs=[
            pl.BlockSpec((tb, 8), lambda i: (i, 0)),        # x tile (pipelined)
            pl.BlockSpec((2, 8, 32), lambda i: (0, 0, 0)),  # folded weights (resident)
            pl.BlockSpec((2, 1, 32), lambda i: (0, 0, 0)),  # folded biases (resident)
        ],
        out_specs=pl.BlockSpec((tb, 32), lambda i: (i, 0)),
        compiler_params=pltpu.CompilerParams(
            dimension_semantics=("parallel",),          # shard batch tiles across TCs
            vmem_limit_bytes=32 * 1024 * 1024,          # raises v5e's 16 MiB default
        ),
        cost_estimate=pl.CostEstimate(
            flops=int(1120 * B), transcendentals=0, bytes_accessed=int(160 * B)),
    )(x, A, D)

    # (B, 32) -> (B, 4, 8) is a free (bitcast-level) reshape — no transpose.
    return out2d.reshape(B, 4, 8)


if __name__ == "__main__":
    key = jax.random.PRNGKey(0)
    kx, k1, k2, k3, k4 = jax.random.split(key, 5)

    # Deterministic params mirroring nn.Linear uniform(-1/sqrt(fan_in), +1/sqrt(fan_in)).
    bound1 = 1.0 / jnp.sqrt(8.0)
    bound2 = 1.0 / jnp.sqrt(4.0)
    w1 = jax.random.uniform(k1, (4, 8), jnp.float32, -bound1, bound1)   # fc1.weight
    b1 = jax.random.uniform(k2, (4,), jnp.float32, -bound1, bound1)     # fc1.bias
    w2 = jax.random.uniform(k3, (8, 4), jnp.float32, -bound2, bound2)   # f2.weight
    b2 = jax.random.uniform(k4, (8,), jnp.float32, -bound2, bound2)     # f2.bias

    # 1) Original spec shape (B=1): small-batch XLA fallback path.
    x1 = jax.random.normal(kx, (1, 8), jnp.float32)
    out1 = jax.block_until_ready(model_forward(x1, w1, b1, w2, b2))
    ref1 = _forward_ref(x1, w1, b1, w2, b2)
    assert out1.shape == (1, 4, 8)
    assert jnp.allclose(out1, ref1, atol=1e-5, rtol=1e-5)

    # 2) Pallas path, default tiling: B=2048 -> tb=256, 8 grid steps.
    x2 = jax.random.normal(jax.random.fold_in(kx, 1), (2048, 8), jnp.float32)
    out2 = jax.block_until_ready(model_forward(x2, w1, b1, w2, b2))
    ref2 = _forward_ref(x2, w1, b1, w2, b2)
    assert out2.shape == (2048, 4, 8)
    assert jnp.allclose(out2, ref2, atol=1e-3, rtol=1e-3)

    # 3) Pallas path, B not a multiple of 128 (masked edge stores):
    #    B=333, tb=128 -> 3 grid steps, last tile has 77 valid rows.
    x3 = jax.random.normal(jax.random.fold_in(kx, 2), (333, 8), jnp.float32)
    out3 = jax.block_until_ready(model_forward(x3, w1, b1, w2, b2, block_b=128))
    ref3 = _forward_ref(x3, w1, b1, w2, b2)
    assert out3.shape == (333, 4, 8)
    assert jnp.allclose(out3, ref3, atol=1e-3, rtol=1e-3)

    print("KERNEL_OK")
</pallas_src>

<mosaic_0001>
module attributes {stable_mosaic.version = 11 : i64} {
  func.func @mlp_outer_kernel(%arg0: i32, %arg1: memref<256x8xf32, #tpu.memory_space<vmem>>, %arg2: memref<2x8x32xf32, #tpu.memory_space<vmem>>, %arg3: memref<2x1x32xf32, #tpu.memory_space<vmem>>, %arg4: memref<256x32xf32, #tpu.memory_space<vmem>>) attributes {dimension_semantics = [#tpu.dimension_semantics<parallel>], iteration_bounds = array<i64: 8>, scalar_prefetch = 0 : i64, scratch_operands = 0 : i64, tpu.core_type = #tpu.core_type<tc>, window_params = [{transform_indices = @transform_0, window_bounds = array<i64: 256, 8>}, {pipeline_mode = #tpu.pipeline_mode<synchronous>, transform_indices = @transform_1, window_bounds = array<i64: 2, 8, 32>}, {pipeline_mode = #tpu.pipeline_mode<synchronous>, transform_indices = @transform_2, window_bounds = array<i64: 2, 1, 32>}, {transform_indices = @transform_3, window_bounds = array<i64: 256, 32>}]} {
    %c0 = arith.constant 0 : index
    %c0_0 = arith.constant 0 : index
    %0 = vector.load %arg1[%c0, %c0_0] : memref<256x8xf32, #tpu.memory_space<vmem>>, vector<256x8xf32>
    %c0_1 = arith.constant 0 : index
    %c0_2 = arith.constant 0 : index
    %c0_3 = arith.constant 0 : index
    %1 = vector.load %arg2[%c0_1, %c0_2, %c0_3] : memref<2x8x32xf32, #tpu.memory_space<vmem>>, vector<1x8x32xf32>
    %2 = vector.shape_cast %1 : vector<1x8x32xf32> to vector<8x32xf32>
    %cst = arith.constant dense<0.000000e+00> : vector<256x32xf32>
    %3 = tpu.matmul %0, %2, %cst {dimension_numbers = #tpu.dot_dimension_numbers<[1], [0], [0], [1], [0, 0, 1, 1], [], []>, precision = #tpu.contract_precision<fp32>} : vector<256x8xf32>, vector<8x32xf32>, vector<256x32xf32> -> vector<256x32xf32>
    %c0_4 = arith.constant 0 : index
    %c0_5 = arith.constant 0 : index
    %c0_6 = arith.constant 0 : index
    %4 = vector.load %arg3[%c0_4, %c0_5, %c0_6] : memref<2x1x32xf32, #tpu.memory_space<vmem>>, vector<1x1x32xf32>
    %5 = vector.shape_cast %4 : vector<1x1x32xf32> to vector<1x32xf32>
    %6 = vector.broadcast %5 : vector<1x32xf32> to vector<256x32xf32>
    %7 = arith.addf %3, %6 : vector<256x32xf32>
    %c1 = arith.constant 1 : index
    %c0_7 = arith.constant 0 : index
    %c0_8 = arith.constant 0 : index
    %8 = vector.load %arg2[%c1, %c0_7, %c0_8] : memref<2x8x32xf32, #tpu.memory_space<vmem>>, vector<1x8x32xf32>
    %9 = vector.shape_cast %8 : vector<1x8x32xf32> to vector<8x32xf32>
    %cst_9 = arith.constant dense<0.000000e+00> : vector<256x32xf32>
    %10 = tpu.matmul %0, %9, %cst_9 {dimension_numbers = #tpu.dot_dimension_numbers<[1], [0], [0], [1], [0, 0, 1, 1], [], []>, precision = #tpu.contract_precision<fp32>} : vector<256x8xf32>, vector<8x32xf32>, vector<256x32xf32> -> vector<256x32xf32>
    %c1_10 = arith.constant 1 : index
    %c0_11 = arith.constant 0 : index
    %c0_12 = arith.constant 0 : index
    %11 = vector.load %arg3[%c1_10, %c0_11, %c0_12] : memref<2x1x32xf32, #tpu.memory_space<vmem>>, vector<1x1x32xf32>
    %12 = vector.shape_cast %11 : vector<1x1x32xf32> to vector<1x32xf32>
    %13 = vector.broadcast %12 : vector<1x32xf32> to vector<256x32xf32>
    %14 = arith.addf %10, %13 : vector<256x32xf32>
    %15 = arith.mulf %7, %14 : vector<256x32xf32>
    %c0_13 = arith.constant 0 : index
    %c0_14 = arith.constant 0 : index
    %16 = vector.load %arg4[%c0_13, %c0_14] : memref<256x32xf32, #tpu.memory_space<vmem>>, vector<256x32xf32>
    tpu.vector_store %arg4[%c0_13, %c0_14], %15 {strides = array<i32>} : memref<256x32xf32, #tpu.memory_space<vmem>>, vector<256x32xf32>,
    return
  }
  func.func @transform_0(%arg0: i32) -> (i32, i32) {
    %c0_i32 = arith.constant 0 : i32
    %c0_i32_0 = arith.constant 0 : i32
    return %arg0, %c0_i32 : i32, i32
  }
  func.func @transform_1(%arg0: i32) -> (i32, i32, i32) {
    %c0_i32 = arith.constant 0 : i32
    %c0_i32_0 = arith.constant 0 : i32
    %c0_i32_1 = arith.constant 0 : i32
    %c0_i32_2 = arith.constant 0 : i32
    return %c0_i32, %c0_i32_0, %c0_i32_1 : i32, i32, i32
  }
  func.func @transform_2(%arg0: i32) -> (i32, i32, i32) {
    %c0_i32 = arith.constant 0 : i32
    %c0_i32_0 = arith.constant 0 : i32
    %c0_i32_1 = arith.constant 0 : i32
    %c0_i32_2 = arith.constant 0 : i32
    return %c0_i32, %c0_i32_0, %c0_i32_1 : i32, i32, i32
  }
  func.func @transform_3(%arg0: i32) -> (i32, i32) {
    %c0_i32 = arith.constant 0 : i32
    %c0_i32_0 = arith.constant 0 : i32
    return %arg0, %c0_i32 : i32, i32
  }
}

</mosaic_0001>

<bundles_post_ra>
// kernel: tpu_custom_call.1
= control target key start
LH: loop header
LB: loop body
LE: loop exit
PB: predicated region body
PF: predicated region fallthrough
CT: control target
= control target key end

     0   :  { %s5047_s12 = smov 0   ;;  %s6665_s0 = inlined_call_operand.vmem [shape: f32[2048,8], index: 0, kind: input, shape index: {}]   ;;  %s6666_s1 = inlined_call_operand.vmem [shape: f32[2,8,32], index: 1, kind: input, shape index: {}]   ;;  %s6667_s2 = inlined_call_operand.vmem [shape: f32[2,1,32], index: 2, kind: input, shape index: {}]   ;;  %s6668_s3 = inlined_call_operand.vmem [shape: f32[2048,32], index: 3, kind: output, shape index: {}]  }
   0x1 LB: > { %s4000_s13 = sadd.s32 4294967295, %s5025_s12   ;;  %p4004_p0 = scmp.ge.s32.totalorder %s5025_s12, 1  ;;  %s5025_s12 = sphi %s5047_s12, %s13_s12  }
   0x2   : > { %p138_p1 = scmp.lt.s32.totalorder %s5025_s12, 9 }
   0x4   : > { %p139_p2 = pnand %p4004_p0, %p138_p1 }
   0x6   : > { %142 = sbr.rel (%p139_p2) target bundleno = 613 (0x265), region = 32 }
   0xb   : > { %v206_v0 = vld [vmem:[%s6666_s1] sm:$0xff]  ;;  %s4005_s16 = sshll.u32 %s4000_s13, 5  ;;  %vm214_vm0 = vcmask 64512   ;;  %vm3911_vm1 = vcmask 261120  }
   0xc   : > { %v5058_v1 = vand.u32 4294901760, %v206_v0  ;;  %p163_p3 = scmp.lt.s32.totalorder %s4005_s16, 255 }
   0xe   : > { %4411 = vmatprep.subr.mxu0 %v5058_v1  ;;  %v5062_v2 = vsub.f32 %v206_v0, %v5058_v1  ;;  %s7265_s16 = smov (!%p163_p3, %s4005_s16), 255 }
   0xf   : > { %4412 = vmatpush3.msra.mxu0 %v5058_v1  ;;  %s4006_s17 = sshll.u32 %s7265_s16, 3 }
  0x10   : > { %v5068_v3 = vand.u32 4294901760, %v5062_v2  ;;  %4511 = vmatprep.subr.mxu0 %v5062_v2  ;;  %s5077_s20 = scalar_lea.vmem %s6665_s0, %s4006_s17  ;;  %s6483_s29 = scalar_lea.vmem %s6668_s3, %s4006_s17 }
  0x11   : > { %v174_v5 = vld [vmem:[%s5077_s20] sm:$0xff]  ;;  %v175_v6 = vld [vmem:[%s5077_s20 + $0x8] sm:$0xff]  ;;  %v176_v7 = vld [vmem:[%s5077_s20 + $0x10] sm:$0xff] }
  0x12   : > { %v731_v4 = vsub.f32 %v5062_v2, %v5068_v3  ;;  %v216_v8 = vsel %vm214_vm0, %v174_v5, 0  ;;  %v219_v9 = vsel %vm214_vm0, %v175_v6, 0  ;;  %v222_v10 = vsel %vm214_vm0, %v176_v7, 0  ;;  %v177_v11 = vld [vmem:[%s5077_s20 + $0x18] sm:$0xff]  ;;  %v178_v12 = vld [vmem:[%s5077_s20 + $0x20] sm:$0xff]  ;;  %v179_v13 = vld [vmem:[%s5077_s20 + $0x28] sm:$0xff] }
  0x13   : > { %v5090_v15 = vand.u32 4294901760, %v216_v8  ;;  %v5092_v16 = vand.u32 4294901760, %v219_v9  ;;  %v5094_v17 = vand.u32 4294901760, %v222_v10  ;;  %v180_v18 = vld [vmem:[%s5077_s20 + $0x30] sm:$0xff]  ;;  %v181_v19 = vld [vmem:[%s5077_s20 + $0x38] sm:$0xff]  ;;  %v225_v20 = vsel %vm214_vm0, %v177_v11, 0 }
  0x14   : > { %v732_v14 = vand.u32 4294901760, %v731_v4  ;;  %v228_v21 = vsel %vm214_vm0, %v178_v12, 0  ;;  %v231_v22 = vsel %vm214_vm0, %v179_v13, 0  ;;  %v234_v23 = vsel %vm214_vm0, %v180_v18, 0  ;;  %v182_v48 = vld [vmem:[%s5077_s20 + $0x40] sm:$0xff]  ;;  %v183_v49 = vld [vmem:[%s5077_s20 + $0x48] sm:$0xff] }
  0x15   : > { %6850 = vst [vmem:[#allocation2_spill] sm:$0xff] %v5090_v15  ;;  %6851 = vst [vmem:[#allocation3_spill] sm:$0xff] %v5092_v16  ;;  %v5103_v24 = vsub.f32 %v216_v8, %v5090_v15  ;;  %4463 = vmatprep.mubr.f32.mxu1 %v5090_v15  ;;  %v5107_v25 = vsub.f32 %v219_v9, %v5092_v16  ;;  %v5110_v26 = vsub.f32 %v222_v10, %v5094_v17  ;;  %v184_v50 = vld [vmem:[%s5077_s20 + $0x50] sm:$0xff]  ;;  %v185_v59 = vld [vmem:[%s5077_s20 + $0x58] sm:$0xff] }
  0x16   : > { %6852 = vst [vmem:[#allocation4_spill] sm:$0xff] %v5094_v17  ;;  %4461 = vmatprep.subr.mxu1 %v732_v14  ;;  %v5112_v27 = vand.u32 4294901760, %v225_v20  ;;  %v5114_v28 = vand.u32 4294901760, %v228_v21  ;;  %v5116_v29 = vand.u32 4294901760, %v231_v22  ;;  %v5118_v30 = vand.u32 4294901760, %v234_v23  ;;  %v186_v63 = vld [vmem:[%s5077_s20 + $0x60] sm:$0xff] }
  0x17   : > { %4462 = vmatpush3.msra.mxu1 %v732_v14  ;;  %v237_v31 = vsel %vm214_vm0, %v181_v19, 0  ;;  %v5122_v32 = vand.u32 4294901760, %v5103_v24  ;;  %v5125_v33 = vand.u32 4294901760, %v5107_v25  ;;  %v5130_v34 = vand.u32 4294901760, %v5110_v26  ;;  %v187_v0 = vld [vmem:[%s5077_s20 + $0x68] sm:$0xff]  ;;  %v188_v12 = vld [vmem:[%s5077_s20 + $0x70] sm:$0xff] }
  0x18   : > { %6853 = vst [vmem:[#allocation5_spill] sm:$0xff] %v5112_v27  ;;  %6854 = vst [vmem:[#allocation6_spill] sm:$0xff] %v5114_v28  ;;  %4464 = vmatmul.mubr.f32.vlgmr.msra.gmra.mxu1 %v5092_v16  ;;  %4561 = vmatprep.subr.mxu1 %v5058_v1  ;;  %v5133_v35 = vsub.f32 %v225_v20, %v5112_v27  ;;  %v5138_v36 = vsub.f32 %v228_v21, %v5114_v28  ;;  %v5146_v39 = vand.u32 4294901760, %v237_v31  ;;  %v189_v13 = vld [vmem:[%s5077_s20 + $0x78] sm:$0xff] }
  0x19   : > { %6855 = vst [vmem:[#allocation7_spill] sm:$0xff] %v5116_v29  ;;  %6856 = vst [vmem:[#allocation8_spill] sm:$0xff] %v5118_v30  ;;  %4562 = vmatpush3.msra.mxu1 %v5058_v1  ;;  %4466 = vmatprep.mubr.f32.mxu1 %v5094_v17  ;;  %v5141_v37 = vsub.f32 %v231_v22, %v5116_v29  ;;  %v5144_v38 = vsub.f32 %v234_v23, %v5118_v30  ;;  %v240_v60 = vsel %vm214_vm0, %v182_v48, 0 }
  0x1a   : > { %6859 = vst [vmem:[#allocation11_spill] sm:$0xff] %v5146_v39  ;;  %v380_v40 = vsub.f32 %v5103_v24, %v5122_v32  ;;  %v390_v41 = vsub.f32 %v5107_v25, %v5125_v33  ;;  %v400_v42 = vsub.f32 %v5110_v26, %v5130_v34  ;;  %v5155_v43 = vand.u32 4294901760, %v5133_v35  ;;  %4661 = vmatprep.subr.mxu1 %v5058_v1 }
  0x1b   : > { %6857 = vst [vmem:[#allocation9_spill] sm:$0xff] %v5141_v37  ;;  %6858 = vst [vmem:[#allocation10_spill] sm:$0xff] %v5144_v38  ;;  %v5159_v44 = vand.u32 4294901760, %v5138_v36  ;;  %v5162_v45 = vand.u32 4294901760, %v5141_v37  ;;  %v5165_v46 = vand.u32 4294901760, %v5144_v38  ;;  %v5168_v47 = vsub.f32 %v237_v31, %v5146_v39 }
  0x1c   : > { %v5173_v51 = vand.u32 4294901760, %v380_v40  ;;  %v5175_v52 = vand.u32 4294901760, %v390_v41  ;;  %v5177_v53 = vand.u32 4294901760, %v400_v42  ;;  %v410_v54 = vsub.f32 %v5133_v35, %v5155_v43  ;;  %4467 = vmatmul.mubr.f32.gmra.mxu1 %v5112_v27 }
  0x1d   : > { %6860 = vst [vmem:[#allocation12_spill] sm:$0xff] %v5168_v47  ;;  %v420_v55 = vsub.f32 %v5138_v36, %v5159_v44  ;;  %4469 = vmatprep.mubr.f32.mxu1 %v5114_v28  ;;  %v430_v56 = vsub.f32 %v5141_v37, %v5162_v45  ;;  %v440_v57 = vsub.f32 %v5144_v38, %v5165_v46  ;;  %v5190_v58 = vand.u32 4294901760, %v5168_v47  ;;  %v197_v28 = vld [vmem:[%s5077_s20 + $0xb8] sm:$0xff] }
  0x1e   : > { %6861 = vst [vmem:[#allocation13_spill] sm:$0xff] %v5173_v51  ;;  %6862 = vst [vmem:[#allocation14_spill] sm:$0xff] %v5175_v52  ;;  %4413 = vmatprep.mubr.f32.mxu0 %v5173_v51  ;;  %v243_v61 = vsel %vm214_vm0, %v183_v49, 0  ;;  %v246_v62 = vsel %vm214_vm0, %v184_v50, 0  ;;  %v5200_v4 = vand.u32 4294901760, %v410_v54  ;;  %v5210_v8 = vand.u32 4294901760, %v240_v60 }
  0x1f   : > { %6863 = vst [vmem:[#allocation15_spill] sm:$0xff] %v5177_v53  ;;  %6864 = vst [vmem:[#allocation16_spill] sm:$0xff] %v5190_v58  ;;  %4414 = vmatmul.mubr.f32.vlgmr.msra.gmra.mxu0 %v5175_v52  ;;  %v5202_v5 = vand.u32 4294901760, %v420_v55  ;;  %v5204_v6 = vand.u32 4294901760, %v430_v56  ;;  %v5206_v7 = vand.u32 4294901760, %v440_v57  ;;  %v5212_v9 = vand.u32 4294901760, %v243_v61 }
  0x20   : > { %6865 = vst [vmem:[#allocation17_spill] sm:$0xff] %v5200_v4  ;;  %4512 = vmatpush3.msra.mxu0 %v5062_v2  ;;  %4416 = vmatprep.mubr.f32.mxu0 %v5177_v53  ;;  %6869 = vst [vmem:[#allocation21_spill] sm:$0xff] %v5210_v8  ;;  %v5214_v10 = vand.u32 4294901760, %v246_v62  ;;  %v249_v11 = vsel %vm214_vm0, %v185_v59, 0  ;;  %v450_v14 = vsub.f32 %v5168_v47, %v5190_v58  ;;  %v252_v2 = vsel %vm214_vm0, %v186_v63, 0  ;;  %v194_v53 = vld [vmem:[%s5077_s20 + $0xa0] sm:$0xff] }
  0x21   : > { %6866 = vst [vmem:[#allocation18_spill] sm:$0xff] %v5202_v5  ;;  %6867 = vst [vmem:[#allocation19_spill] sm:$0xff] %v5204_v6  ;;  %4470 = vmatmul.mubr.f32.gmra.mxu1 %v5116_v29  ;;  %v5222_v18 = vand.u32 4294901760, %v249_v11  ;;  %v255_v19 = vsel %vm214_vm0, %v187_v0, 0  ;;  %4611 = vmatprep.subr.mxu0 %v5068_v3  ;;  %v5229_v20 = vsub.f32 %v240_v60, %v5210_v8  ;;  %v5237_v23 = vand.u32 4294901760, %v252_v2 }
  0x22   : > { %6868 = vst [vmem:[#allocation20_spill] sm:$0xff] %v5206_v7  ;;  %6870 = vst [vmem:[#allocation22_spill] sm:$0xff] %v5212_v9  ;;  %4472 = vmatprep.mubr.f32.mxu1 %v5118_v30  ;;  %v5232_v21 = vsub.f32 %v243_v61, %v5212_v9  ;;  %v5235_v22 = vsub.f32 %v246_v62, %v5214_v10  ;;  %v5243_v40 = vand.u32 4294901760, %v255_v19  ;;  %v258_v41 = vsel %vm214_vm0, %v188_v12, 0  ;;  %v191_v12 = vld [vmem:[%s5077_s20 + $0x88] sm:$0xff] }
  0x23   : > { %6871 = vst [vmem:[#allocation23_spill] sm:$0xff] %v5214_v10  ;;  %6872 = vst [vmem:[#allocation24_spill] sm:$0xff] %v5222_v18  ;;  %4417 = vmatmul.mubr.f32.gmra.mxu0 %v5200_v4  ;;  %v5241_v31 = vsub.f32 %v249_v11, %v5222_v18  ;;  %v261_v42 = vsel %vm214_vm0, %v189_v13, 0  ;;  %v5249_v48 = vand.u32 4294901760, %v5229_v20  ;;  %v5258_v54 = vsub.f32 %v252_v2, %v5237_v23  ;;  %v190_v11 = vld [vmem:[%s5077_s20 + $0x80] sm:$0xff]  ;;  %v192_v13 = vld [vmem:[%s5077_s20 + $0x90] sm:$0xff] }
  0x24   : > { %6873 = vst [vmem:[#allocation25_spill] sm:$0xff] %v5229_v20  ;;  %6874 = vst [vmem:[#allocation26_spill] sm:$0xff] %v5232_v21  ;;  %4419 = vmatprep.mubr.f32.mxu0 %v5202_v5  ;;  %v5252_v49 = vand.u32 4294901760, %v5232_v21  ;;  %v5255_v50 = vand.u32 4294901760, %v5235_v22  ;;  %v5265_v56 = vsub.f32 %v255_v19, %v5243_v40  ;;  %v5267_v57 = vand.u32 4294901760, %v258_v41 }
  0x25   : > { %6875 = vst [vmem:[#allocation27_spill] sm:$0xff] %v5235_v22  ;;  %6876 = vst [vmem:[#allocation28_spill] sm:$0xff] %v5237_v23  ;;  %4473 = vmatmul.mubr.f32.gmra.mxu1 %v5146_v39  ;;  %v5262_v55 = vand.u32 4294901760, %v5241_v31  ;;  %v460_v59 = vsub.f32 %v5229_v20, %v5249_v48  ;;  %v5272_v60 = vand.u32 4294901760, %v261_v42  ;;  %v5275_v61 = vand.u32 4294901760, %v450_v14  ;;  %v196_v39 = vld [vmem:[%s5077_s20 + $0xb0] sm:$0xff] }
  0x26   : > { %6877 = vst [vmem:[#allocation29_spill] sm:$0xff] %v5241_v31  ;;  %6878 = vst [vmem:[#allocation30_spill] sm:$0xff] %v5243_v40  ;;  %4475 = vmatprep.mubr.f32.mxu1 %v5210_v8  ;;  %v470_v62 = vsub.f32 %v5232_v21, %v5252_v49  ;;  %v5280_v63 = vand.u32 4294901760, %v5258_v54  ;;  %v5283_v0 = vsub.f32 %v258_v41, %v5267_v57  ;;  %v193_v41 = vld [vmem:[%s5077_s20 + $0x98] sm:$0xff]  ;;  %v270_v4 = vsel %vm214_vm0, %v192_v13, 0 }
  0x27   : > { %6879 = vst [vmem:[#allocation31_spill] sm:$0xff] %v5249_v48  ;;  %6880 = vst [vmem:[#allocation32_spill] sm:$0xff] %v5252_v49  ;;  %4420 = vmatmul.mubr.f32.gmra.mxu0 %v5204_v6  ;;  %v5289_v2 = vand.u32 4294901760, %v460_v59  ;;  %v480_v14 = vsub.f32 %v5235_v22, %v5255_v50  ;;  %v490_v19 = vsub.f32 %v5241_v31, %v5262_v55  ;;  %v5297_v6 = vand.u32 4294901760, %v5265_v56 }
  0x28   : > { %6881 = vst [vmem:[#allocation33_spill] sm:$0xff] %v5255_v50  ;;  %6882 = vst [vmem:[#allocation34_spill] sm:$0xff] %v5258_v54  ;;  %4422 = vmatprep.mubr.f32.mxu0 %v5206_v7  ;;  %v5302_v5 = vsub.f32 %v261_v42, %v5272_v60  ;;  %v264_v59 = vsel %vm214_vm0, %v190_v11, 0  ;;  %v267_v7 = vsel %vm214_vm0, %v191_v12, 0  ;;  %v5309_v52 = vand.u32 4294901760, %v470_v62  ;;  %v195_v62 = vld [vmem:[%s5077_s20 + $0xa8] sm:$0xff] }
  0x29   : > { %6883 = vst [vmem:[#allocation35_spill] sm:$0xff] %v5262_v55  ;;  %6884 = vst [vmem:[#allocation36_spill] sm:$0xff] %v5265_v56  ;;  %4476 = vmatmul.mubr.f32.gmra.mxu1 %v5212_v9  ;;  %v500_v51 = vsub.f32 %v5258_v54, %v5280_v63  ;;  %v5316_v42 = vand.u32 4294901760, %v264_v59  ;;  %v5319_v11 = vand.u32 4294901760, %v480_v14  ;;  %v5321_v12 = vand.u32 4294901760, %v267_v7 }
  0x2a   : > { %6885 = vst [vmem:[#allocation37_spill] sm:$0xff] %v5267_v57  ;;  %6886 = vst [vmem:[#allocation38_spill] sm:$0xff] %v5272_v60  ;;  %4478 = vmatprep.mubr.f32.mxu1 %v5214_v10  ;;  %v5314_v10 = vand.u32 4294901760, %v5283_v0  ;;  %v5323_v13 = vand.u32 4294901760, %v270_v4  ;;  %v276_v8 = vsel %vm214_vm0, %v194_v53, 0  ;;  %v5333_v30 = vand.u32 4294901760, %v490_v19 }
  0x2b   : > { %6887 = vst [vmem:[#allocation39_spill] sm:$0xff] %v5275_v61  ;;  %6888 = vst [vmem:[#allocation40_spill] sm:$0xff] %v5280_v63  ;;  %4423 = vmatmul.mubr.f32.gmra.mxu0 %v5275_v61  ;;  %v273_v61 = vsel %vm214_vm0, %v193_v41, 0  ;;  %v5329_v9 = vsub.f32 %v264_v59, %v5316_v42  ;;  %v510_v14 = vsub.f32 %v5265_v56, %v5297_v6  ;;  %v5344_v59 = vand.u32 4294901760, %v500_v51 }
  0x2c   : > { %6889 = vst [vmem:[#allocation41_spill] sm:$0xff] %v5283_v0  ;;  %6890 = vst [vmem:[#allocation42_spill] sm:$0xff] %v5289_v2  ;;  %4425 = vmatprep.mubr.f32.mxu0 %v5289_v2  ;;  %v5339_v2 = vand.u32 4294901760, %v5302_v5  ;;  %v5341_v41 = vand.u32 4294901760, %v273_v61  ;;  %v520_v53 = vsub.f32 %v5283_v0, %v5314_v10  ;;  %v5349_v19 = vsub.f32 %v267_v7, %v5321_v12 }
  0x2d   : > { %6891 = vst [vmem:[#allocation43_spill] sm:$0xff] %v5297_v6  ;;  %6892 = vst [vmem:[#allocation44_spill] sm:$0xff] %v5302_v5  ;;  %4479 = vmatmul.mubr.f32.gmra.mxu1 %v5222_v18  ;;  %v5354_v18 = vand.u32 4294901760, %v5329_v9  ;;  %v5357_v29 = vsub.f32 %v270_v4, %v5323_v13  ;;  %v282_v51 = vsel %vm214_vm0, %v196_v39, 0  ;;  %v198_v4 = vld [vmem:[%s5077_s20 + $0xc0] sm:$0xff]  ;;  %v5374_v27 = vand.u32 4294901760, %v510_v14 }
  0x2e   : > { %6893 = vst [vmem:[#allocation45_spill] sm:$0xff] %v5309_v52  ;;  %6894 = vst [vmem:[#allocation46_spill] sm:$0xff] %v5314_v10  ;;  %4481 = vmatprep.mubr.f32.mxu1 %v5237_v23  ;;  %v279_v23 = vsel %vm214_vm0, %v195_v62, 0  ;;  %v530_v7 = vsub.f32 %v5302_v5, %v5339_v2  ;;  %v5368_v62 = vsub.f32 %v273_v61, %v5341_v41  ;;  %v5377_v39 = vand.u32 4294901760, %v5349_v19 }
  0x2f   : > { %6895 = vst [vmem:[#allocation47_spill] sm:$0xff] %v5316_v42  ;;  %6896 = vst [vmem:[#allocation48_spill] sm:$0xff] %v5319_v11  ;;  %4426 = vmatmul.mubr.f32.gmra.mxu0 %v5309_v52  ;;  %v5359_v52 = vand.u32 4294901760, %v276_v8  ;;  %v5383_v17 = vand.u32 4294901760, %v520_v53  ;;  %v540_v61 = vsub.f32 %v5329_v9, %v5354_v18  ;;  %v5388_v16 = vand.u32 4294901760, %v5357_v29 }
  0x30   : > { %6897 = vst [vmem:[#allocation49_spill] sm:$0xff] %v5321_v12  ;;  %6898 = vst [vmem:[#allocation50_spill] sm:$0xff] %v5323_v13  ;;  %4428 = vmatprep.mubr.f32.mxu0 %v5319_v11  ;;  %v5370_v11 = vand.u32 4294901760, %v279_v23  ;;  %v288_v15 = vsel %vm214_vm0, %v198_v4, 0  ;;  %v5396_v5 = vand.u32 4294901760, %v530_v7  ;;  %v550_v4 = vsub.f32 %v5349_v19, %v5377_v39 }
  0x31   : > { %6899 = vst [vmem:[#allocation51_spill] sm:$0xff] %v5329_v9  ;;  %6900 = vst [vmem:[#allocation52_spill] sm:$0xff] %v5333_v30  ;;  %4482 = vmatmul.mubr.f32.gmra.mxu1 %v5243_v40  ;;  %v5379_v40 = vand.u32 4294901760, %v282_v51  ;;  %v5391_v14 = vsub.f32 %v276_v8, %v5359_v52  ;;  %v200_v8 = vld [vmem:[%s5077_s20 + $0xd0] sm:$0xff]  ;;  %v560_v9 = vsub.f32 %v5357_v29, %v5388_v16 }
  0x32   : > { %6901 = vst [vmem:[#allocation53_spill] sm:$0xff] %v5339_v2  ;;  %6902 = vst [vmem:[#allocation54_spill] sm:$0xff] %v5341_v41  ;;  %4484 = vmatprep.mubr.f32.mxu1 %v5267_v57  ;;  %v285_v57 = vsel %vm214_vm0, %v197_v28, 0  ;;  %v5400_v28 = vand.u32 4294901760, %v5368_v62  ;;  %v5403_v53 = vsub.f32 %v279_v23, %v5370_v11  ;;  %v5418_v23 = vand.u32 4294901760, %v540_v61 }
  0x33   : > { %6903 = vst [vmem:[#allocation55_spill] sm:$0xff] %v5344_v59  ;;  %6904 = vst [vmem:[#allocation56_spill] sm:$0xff] %v5349_v19  ;;  %4429 = vmatmul.mubr.f32.gmra.mxu0 %v5333_v30  ;;  %v199_v30 = vld [vmem:[%s5077_s20 + $0xc8] sm:$0xff]  ;;  %v5412_v7 = vsub.f32 %v282_v51, %v5379_v40  ;;  %v294_v19 = vsel %vm214_vm0, %v200_v8, 0  ;;  %v201_v51 = vld [vmem:[%s5077_s20 + $0xd8] sm:$0xff] }
  0x34   : > { %6905 = vst [vmem:[#allocation57_spill] sm:$0xff] %v5354_v18  ;;  %6906 = vst [vmem:[#allocation58_spill] sm:$0xff] %v5357_v29  ;;  %4431 = vmatprep.mubr.f32.mxu0 %v5344_v59  ;;  %v5405_v59 = vand.u32 4294901760, %v285_v57  ;;  %v5439_v29 = vand.u32 4294901760, %v550_v4  ;;  %v570_v8 = vsub.f32 %v5368_v62, %v5400_v28  ;;  %v297_v4 = vsel %vm214_vm0, %v201_v51, 0 }
  0x35   : > { %6907 = vst [vmem:[#allocation59_spill] sm:$0xff] %v5359_v52  ;;  %6908 = vst [vmem:[#allocation60_spill] sm:$0xff] %v5368_v62  ;;  %4485 = vmatmul.mubr.f32.gmra.mxu1 %v5272_v60  ;;  %v291_v60 = vsel %vm214_vm0, %v199_v30, 0 }
  0x36   : > { %6909 = vst [vmem:[#allocation61_spill] sm:$0xff] %v5370_v11  ;;  %6910 = vst [vmem:[#allocation62_spill] sm:$0xff] %v5374_v27  ;;  %4487 = vmatprep.mubr.f32.mxu1 %v5316_v42  ;;  %v5414_v42 = vand.u32 4294901760, %v288_v15  ;;  %v5433_v30 = vsub.f32 %v285_v57, %v5405_v59  ;;  %v5435_v61 = vand.u32 4294901760, %v291_v60  ;;  %v5450_v57 = vand.u32 4294901760, %v560_v9 }
  0x37   : > { %6911 = vst [vmem:[#allocation63_spill] sm:$0xff] %v5377_v39  ;;  %6912 = vst [vmem:[#allocation64_spill] sm:$0xff] %v5379_v40  ;;  %4432 = vmatmul.mubr.f32.gmra.mxu0 %v5374_v27  ;;  %v5423_v27 = vand.u32 4294901760, %v5391_v14  ;;  %v5430_v39 = vand.u32 4294901760, %v5403_v53  ;;  %v5471_v51 = vand.u32 4294901760, %v570_v8 }
  0x38   : > { %6913 = vst [vmem:[#allocation65_spill] sm:$0xff] %v5383_v17  ;;  %6914 = vst [vmem:[#allocation66_spill] sm:$0xff] %v5388_v16  ;;  %4434 = vmatprep.mubr.f32.mxu0 %v5383_v17  ;;  %v202_v17 = vld [vmem:[%s5077_s20 + $0xe0] sm:$0xff]  ;;  %v5464_v9 = vand.u32 4294901760, %v5433_v30 }
  0x39   : > { %6915 = vst [vmem:[#allocation67_spill] sm:$0xff] %v5391_v14  ;;  %6916 = vst [vmem:[#allocation68_spill] sm:$0xff] %v5396_v5  ;;  %4488 = vmatmul.mubr.f32.gmra.mxu1 %v5321_v12  ;;  %v5447_v12 = vsub.f32 %v288_v15, %v5414_v42  ;;  %v580_v16 = vsub.f32 %v5391_v14, %v5423_v27  ;;  %v300_v62 = vsel %vm214_vm0, %v202_v17, 0  ;;  %v204_v14 = vld [vmem:[%s5077_s20 + $0xf0] sm:$0xff] }
  0x3a   : > { %6917 = vst [vmem:[#allocation69_spill] sm:$0xff] %v5400_v28  ;;  %6918 = vst [vmem:[#allocation70_spill] sm:$0xff] %v5403_v53  ;;  %4490 = vmatprep.mubr.f32.mxu1 %v5323_v13  ;;  %v5444_v13 = vand.u32 4294901760, %v5412_v7  ;;  %v203_v28 = vld [vmem:[%s5077_s20 + $0xe8] sm:$0xff]  ;;  %v590_v15 = vsub.f32 %v5403_v53, %v5430_v39 }
  0x3b   : > { %6919 = vst [vmem:[#allocation71_spill] sm:$0xff] %v5405_v59  ;;  %6920 = vst [vmem:[#allocation72_spill] sm:$0xff] %v5412_v7  ;;  %4435 = vmatmul.mubr.f32.gmra.mxu0 %v5396_v5  ;;  %v5454_v5 = vand.u32 4294901760, %v294_v19  ;;  %v5481_v53 = vand.u32 4294901760, %v580_v16  ;;  %v303_v8 = vsel %vm214_vm0, %v203_v28, 0  ;;  %v610_v16 = vsub.f32 %v5433_v30, %v5464_v9 }
  0x3c   : > { %6921 = vst [vmem:[#allocation73_spill] sm:$0xff] %v5414_v42  ;;  %6922 = vst [vmem:[#allocation74_spill] sm:$0xff] %v5418_v23  ;;  %4437 = vmatprep.mubr.f32.mxu0 %v5418_v23  ;;  %v5467_v23 = vsub.f32 %v291_v60, %v5435_v61  ;;  %v600_v17 = vsub.f32 %v5412_v7, %v5444_v13  ;;  %v205_v7 = vld [vmem:[%s5077_s20 + $0xf8] sm:$0xff] }
  0x3d   : > { %6923 = vst [vmem:[#allocation75_spill] sm:$0xff] %v5423_v27  ;;  %6924 = vst [vmem:[#allocation76_spill] sm:$0xff] %v5430_v39  ;;  %4491 = vmatmul.mubr.f32.gmra.mxu1 %v5341_v41  ;;  %v5478_v41 = vand.u32 4294901760, %v297_v4  ;;  %v5484_v60 = vsub.f32 %v294_v19, %v5454_v5  ;;  %v5486_v39 = vand.u32 4294901760, %v300_v62 }
  0x3e   : > { %6925 = vst [vmem:[#allocation77_spill] sm:$0xff] %v5433_v30  ;;  %6926 = vst [vmem:[#allocation78_spill] sm:$0xff] %v5435_v61  ;;  %4493 = vmatprep.mubr.f32.mxu1 %v5359_v52  ;;  %v5476_v52 = vand.u32 4294901760, %v5447_v12  ;;  %v5501_v19 = vand.u32 4294901760, %v600_v17  ;;  %v309_v17 = vsel %vm214_vm0, %v205_v7, 0 }
  0x3f   : > { %6927 = vst [vmem:[#allocation79_spill] sm:$0xff] %v5439_v29  ;;  %6928 = vst [vmem:[#allocation80_spill] sm:$0xff] %v5444_v13  ;;  %4438 = vmatmul.mubr.f32.gmra.mxu0 %v5439_v29  ;;  %v306_v29 = vsel %vm214_vm0, %v204_v14, 0  ;;  %v5492_v13 = vand.u32 4294901760, %v590_v15  ;;  %v5506_v14 = vsub.f32 %v297_v4, %v5478_v41  ;;  %v5508_v15 = vand.u32 4294901760, %v303_v8 }
  0x40   : > { %6929 = vst [vmem:[#allocation81_spill] sm:$0xff] %v5447_v12  ;;  %6930 = vst [vmem:[#allocation82_spill] sm:$0xff] %v5450_v57  ;;  %4440 = vmatprep.mubr.f32.mxu0 %v5450_v57  ;;  %v5498_v57 = vand.u32 4294901760, %v5467_v23  ;;  %v620_v28 = vsub.f32 %v5447_v12, %v5476_v52  ;;  %v5517_v30 = vand.u32 4294901760, %v306_v29  ;;  %v5524_v4 = vand.u32 4294901760, %v610_v16 }
  0x41   : > { %6931 = vst [vmem:[#allocation83_spill] sm:$0xff] %v5454_v5  ;;  %6932 = vst [vmem:[#allocation84_spill] sm:$0xff] %v5464_v9  ;;  %4494 = vmatmul.mubr.f32.gmra.mxu1 %v5370_v11  ;;  %v5515_v11 = vsub.f32 %v300_v62, %v5486_v39  ;;  %v5531_v62 = vand.u32 4294901760, %v5506_v14  ;;  %v5534_v7 = vsub.f32 %v303_v8, %v5508_v15  ;;  %v5536_v12 = vand.u32 4294901760, %v309_v17 }
  0x42   : > { %6933 = vst [vmem:[#allocation85_spill] sm:$0xff] %v5467_v23  ;;  %6934 = vst [vmem:[#allocation86_spill] sm:$0xff] %v5471_v51  ;;  %4496 = vmatprep.mubr.f32.mxu1 %v5379_v40  ;;  %v5512_v40 = vand.u32 4294901760, %v5484_v60  ;;  %v5541_v16 = vand.u32 4294901760, %v620_v28 }
  0x43   : > { %6935 = vst [vmem:[#allocation87_spill] sm:$0xff] %v5476_v52  ;;  %6936 = vst [vmem:[#allocation88_spill] sm:$0xff] %v5478_v41  ;;  %4441 = vmatmul.mubr.f32.gmra.mxu0 %v5471_v51  ;;  %v4010_v51 = vld [vmem:[%s6666_s1 + $0x8] sm:$0xff]  ;;  %v650_v28 = vsub.f32 %v5506_v14, %v5531_v62 }
  0x44   : > { %6937 = vst [vmem:[#allocation89_spill] sm:$0xff] %v5481_v53  ;;  %6938 = vst [vmem:[#allocation90_spill] sm:$0xff] %v5484_v60  ;;  %4443 = vmatprep.mubr.f32.mxu0 %v5481_v53  ;;  %v630_v53 = vsub.f32 %v5467_v23, %v5498_v57  ;;  %v5538_v52 = vand.u32 4294901760, %v4010_v51 }
  0x45   : > { %6939 = vst [vmem:[#allocation91_spill] sm:$0xff] %v5486_v39  ;;  %6940 = vst [vmem:[#allocation92_spill] sm:$0xff] %v5492_v13  ;;  %4497 = vmatmul.mubr.f32.gmra.mxu1 %v5405_v59  ;;  %v5546_v59 = vand.u32 4294901760, %v5515_v11 }
  0x46   : > { %6941 = vst [vmem:[#allocation93_spill] sm:$0xff] %v5498_v57  ;;  %6942 = vst [vmem:[#allocation94_spill] sm:$0xff] %v5501_v19  ;;  %4499 = vmatprep.mubr.f32.mxu1 %v5414_v42  ;;  %v640_v42 = vsub.f32 %v5484_v60, %v5512_v40  ;;  %v5552_v8 = vand.u32 4294901760, %v630_v53  ;;  %v5562_v60 = vsub.f32 %v309_v17, %v5536_v12  ;;  %v5578_v17 = vand.u32 4294901760, %v650_v28 }
  0x47   : > { %6943 = vst [vmem:[#allocation95_spill] sm:$0xff] %v5506_v14  ;;  %6944 = vst [vmem:[#allocation96_spill] sm:$0xff] %v5512_v40  ;;  %4444 = vmatmul.mubr.f32.gmra.mxu0 %v5492_v13  ;;  %v5549_v13 = vsub.f32 %v306_v29, %v5517_v30  ;;  %v5565_v29 = vsub.f32 %v4010_v51, %v5538_v52 }
  0x48   : > { %6945 = vst [vmem:[#allocation97_spill] sm:$0xff] %v5515_v11  ;;  %6946 = vst [vmem:[#allocation98_spill] sm:$0xff] %v5524_v4  ;;  %4446 = vmatprep.mubr.f32.mxu0 %v5501_v19  ;;  %v5559_v19 = vand.u32 4294901760, %v5534_v7  ;;  %v5568_v53 = vand.u32 4294901760, %v640_v42  ;;  %v5583_v42 = vand.u32 4294901760, %v5562_v60 }
  0x49   : > { %6947 = vst [vmem:[#allocation99_spill] sm:$0xff] %v5531_v62  ;;  %6948 = vst [vmem:[#allocation100_spill] sm:$0xff] %v5534_v7  ;;  %4500 = vmatmul.mubr.f32.gmra.mxu1 %v5435_v61 }
  0x4a   : > { %6949 = vst [vmem:[#allocation101_spill] sm:$0xff] %v5541_v16  ;;  %6950 = vst [vmem:[#allocation102_spill] sm:$0xff] %v5546_v59  ;;  %4502 = vmatprep.mubr.f32.mxu1 %v5454_v5  ;;  %v660_v5 = vsub.f32 %v5515_v11, %v5546_v59  ;;  %v670_v51 = vsub.f32 %v5534_v7, %v5559_v19 }
  0x4b   : > { %6951 = vst [vmem:[#allocation103_spill] sm:$0xff] %v5549_v13  ;;  %6952 = vst [vmem:[#allocation104_spill] sm:$0xff] %v5552_v8  ;;  %4447 = vmatmul.mubr.f32.gmra.mxu0 %v5524_v4  ;;  %v5573_v4 = vand.u32 4294901760, %v5549_v13 }
  0x4c   : > { %6953 = vst [vmem:[#allocation105_spill] sm:$0xff] %v5559_v19  ;;  %6954 = vst [vmem:[#allocation106_spill] sm:$0xff] %v5562_v60  ;;  %4449 = vmatprep.mubr.f32.mxu0 %v5541_v16  ;;  %v5586_v16 = vand.u32 4294901760, %v5565_v29  ;;  %v5589_v61 = vand.u32 4294901760, %v660_v5  ;;  %v5596_v28 = vand.u32 4294901760, %v670_v51 }
  0x4d   : > { %6955 = vst [vmem:[#allocation107_spill] sm:$0xff] %v5568_v53  ;;  %6956 = vst [vmem:[#allocation108_spill] sm:$0xff] %v5573_v4  ;;  %4503 = vmatmul.mubr.f32.gmra.mxu1 %v5478_v41 }
  0x4e   : > { %4505 = vmatprep.mubr.f32.mxu1 %v5486_v39  ;;  %6957 = vst [vmem:[#allocation109_spill] sm:$0xff] %v5583_v42  ;;  %v680_v39 = vsub.f32 %v5549_v13, %v5573_v4  ;;  %v2520_v41 = vsub.f32 %v5565_v29, %v5586_v16 }
  0x4f   : > { %4450 = vmatmul.mubr.f32.gmra.mxu0 %v5552_v8  ;;  %v690_v8 = vsub.f32 %v5562_v60, %v5583_v42 }
  0x50   : > { %4452 = vmatprep.mubr.f32.mxu0 %v5568_v53  ;;  %v5603_v5 = vand.u32 4294901760, %v680_v39  ;;  %v5610_v51 = vand.u32 4294901760, %v2520_v41  ;;  %v6960_v41 = vld [vmem:[#allocation44_spill] sm:$0xff]  ;;  %v6961_v39 = vld [vmem:[#allocation51_spill] sm:$0xff] }
  0x51   : > { %4506 = vmatmul.mubr.f32.gmra.mxu1 %v5508_v15  ;;  %v5608_v53 = vand.u32 4294901760, %v690_v8  ;;  %v6962_v8 = vld [vmem:[#allocation69_spill] sm:$0xff] }
  0x52   : > { %4508 = vmatprep.mubr.f32.mxu1 %v5517_v30 }
  0x53   : > { %4453 = vmatmul.mubr.f32.gmra.mxu0 %v5578_v17 }
  0x54   : > { %4455 = vmatprep.mubr.f32.mxu0 %v5589_v61 }
  0x55   : > { %4509 = vmatmul.mubr.f32.gmra.mxu1 %v5536_v12 }
  0x56   : > { %4563 = vmatprep.mubr.f32.mxu1 %v5122_v32 }
  0x57   : > { %4456 = vmatmul.mubr.f32.gmra.mxu0 %v5596_v28 }
  0x58   : > { %4458 = vmatprep.mubr.f32.mxu0 %v5603_v5 }
  0x59   : > { %4564 = vmatmul.mubr.f32.vlgmr.msra.gmra.mxu1 %v5125_v33 }
  0x5a   : > { %4662 = vmatpush3.msra.mxu1 %v5058_v1  ;;  %4566 = vmatprep.mubr.f32.mxu1 %v5130_v34  ;;  %v6958_v1 = vld [vmem:[#allocation63_spill] sm:$0xff] }
  0x5b   : > { %4459 = vmatmul.mubr.f32.gmra.mxu0 %v5608_v53  ;;  %4761 = vmatprep.subr.mxu1 %v5610_v51 }
  0x5c   : > { %4513 = vmatprep.mubr.f32.mxu0 %v5103_v24 }
  0x5d   : > { %4567 = vmatmul.mubr.f32.gmra.mxu1 %v5155_v43 }
  0x5e   : > { %4569 = vmatprep.mubr.f32.mxu1 %v5159_v44 }
  0x5f   : > { %4514 = vmatmul.mubr.f32.vlgmr.msra.gmra.mxu0 %v5107_v25 }
  0x60   : > { %4612 = vmatpush3.msra.mxu0 %v5068_v3  ;;  %4516 = vmatprep.mubr.f32.mxu0 %v5110_v26  ;;  %v6959_v3 = vld [vmem:[#allocation66_spill] sm:$0xff] }
  0x61   : > { %4570 = vmatmul.mubr.f32.gmra.mxu1 %v5162_v45  ;;  %4711 = vmatprep.subr.mxu0 %v5538_v52 }
  0x62   : > { %4572 = vmatprep.mubr.f32.mxu1 %v5165_v46 }
  0x63   : > { %4517 = vmatmul.mubr.f32.gmra.mxu0 %v5133_v35 }
  0x64   : > { %4519 = vmatprep.mubr.f32.mxu0 %v5138_v36 }
  0x65   : > { %4573 = vmatmul.mubr.f32.gmra.mxu1 %v5190_v58 }
  0x66   : > { %4575 = vmatprep.mubr.f32.mxu1 %v5249_v48 }
  0x67   : > { %4520 = vmatmul.mubr.f32.gmra.mxu0 %v5141_v37 }
  0x68   : > { %4522 = vmatprep.mubr.f32.mxu0 %v5144_v38 }
  0x69   : > { %4576 = vmatmul.mubr.f32.gmra.mxu1 %v5252_v49 }
  0x6a   : > { %4578 = vmatprep.mubr.f32.mxu1 %v5255_v50  ;;  %v7006_v50 = vld [vmem:[#allocation15_spill] sm:$0xff] }
  0x6b   : > { %4523 = vmatmul.mubr.f32.gmra.mxu0 %v5168_v47  ;;  %v7005_v47 = vld [vmem:[#allocation14_spill] sm:$0xff] }
  0x6c   : > { %4525 = vmatprep.mubr.f32.mxu0 %v5229_v20 }
  0x6d   : > { %4579 = vmatmul.mubr.f32.gmra.mxu1 %v5262_v55 }
  0x6e   : > { %4581 = vmatprep.mubr.f32.mxu1 %v5280_v63  ;;  %v7004_v63 = vld [vmem:[#allocation13_spill] sm:$0xff] }
  0x6f   : > { %4526 = vmatmul.mubr.f32.gmra.mxu0 %v5232_v21 }
  0x70   : > { %4528 = vmatprep.mubr.f32.mxu0 %v5235_v22 }
  0x71   : > { %4582 = vmatmul.mubr.f32.gmra.mxu1 %v5297_v6  ;;  %v7003_v6 = vld [vmem:[#allocation91_spill] sm:$0xff] }
  0x72   : > { %4584 = vmatprep.mubr.f32.mxu1 %v5314_v10  ;;  %v7002_v10 = vld [vmem:[#allocation88_spill] sm:$0xff] }
  0x73   : > { %4529 = vmatmul.mubr.f32.gmra.mxu0 %v5241_v31  ;;  %v7001_v31 = vld [vmem:[#allocation83_spill] sm:$0xff] }
  0x74   : > { %4531 = vmatprep.mubr.f32.mxu0 %v5258_v54  ;;  %v6963_v54 = vld [vmem:[#allocation56_spill] sm:$0xff] }
  0x75   : > { %4585 = vmatmul.mubr.f32.gmra.mxu1 %v5339_v2  ;;  %v6964_v2 = vld [vmem:[#allocation58_spill] sm:$0xff] }
  0x76   : > { %4587 = vmatprep.mubr.f32.mxu1 %v5354_v18  ;;  %v6965_v18 = vld [vmem:[#allocation76_spill] sm:$0xff] }
  0x77   : > { %4532 = vmatmul.mubr.f32.gmra.mxu0 %v5265_v56  ;;  %v6966_v56 = vld [vmem:[#allocation80_spill] sm:$0xff] }
  0x78   : > { %4534 = vmatprep.mubr.f32.mxu0 %v5283_v0  ;;  %v6967_v0 = vld [vmem:[#allocation60_spill] sm:$0xff] }
  0x79   : > { %4588 = vmatmul.mubr.f32.gmra.mxu1 %v6958_v1  ;;  %v6968_v1 = vld [vmem:[#allocation67_spill] sm:$0xff] }
  0x7a   : > { %4590 = vmatprep.mubr.f32.mxu1 %v6959_v3  ;;  %v7000_v3 = vld [vmem:[#allocation78_spill] sm:$0xff] }
  0x7b   : > { %4535 = vmatmul.mubr.f32.gmra.mxu0 %v6960_v41  ;;  %v6969_v41 = vld [vmem:[#allocation87_spill] sm:$0xff] }
  0x7c   : > { %4537 = vmatprep.mubr.f32.mxu0 %v6961_v39  ;;  %v6970_v39 = vld [vmem:[#allocation70_spill] sm:$0xff] }
  0x7d   : > { %4591 = vmatmul.mubr.f32.gmra.mxu1 %v6962_v8  ;;  %v6971_v8 = vld [vmem:[#allocation72_spill] sm:$0xff] }
  0x7e   : > { %4593 = vmatprep.mubr.f32.mxu1 %v5423_v27  ;;  %v6999_v27 = vld [vmem:[#allocation73_spill] sm:$0xff] }
  0x7f   : > { %4538 = vmatmul.mubr.f32.gmra.mxu0 %v6963_v54  ;;  %v6998_v54 = vld [vmem:[#allocation71_spill] sm:$0xff] }
  0x80   : > { %4540 = vmatprep.mubr.f32.mxu0 %v6964_v2  ;;  %v6972_v2 = vld [vmem:[#allocation77_spill] sm:$0xff] }
  0x81   : > { %4594 = vmatmul.mubr.f32.gmra.mxu1 %v6965_v18  ;;  %v6973_v18 = vld [vmem:[#allocation81_spill] sm:$0xff] }
  0x82   : > { %4596 = vmatprep.mubr.f32.mxu1 %v6966_v56  ;;  %v6997_v56 = vld [vmem:[#allocation64_spill] sm:$0xff] }
  0x83   : > { %4541 = vmatmul.mubr.f32.gmra.mxu0 %v6967_v0  ;;  %v6996_v0 = vld [vmem:[#allocation61_spill] sm:$0xff] }
  0x84   : > { %4543 = vmatprep.mubr.f32.mxu0 %v6968_v1  ;;  %v6995_v1 = vld [vmem:[#allocation59_spill] sm:$0xff] }
  0x85   : > { %4597 = vmatmul.mubr.f32.gmra.mxu1 %v5464_v9  ;;  %v6974_v9 = vld [vmem:[#allocation90_spill] sm:$0xff] }
  0x86   : > { %4599 = vmatprep.mubr.f32.mxu1 %v6969_v41  ;;  %v6994_v41 = vld [vmem:[#allocation54_spill] sm:$0xff] }
  0x87   : > { %4544 = vmatmul.mubr.f32.gmra.mxu0 %v6970_v39  ;;  %v6993_v39 = vld [vmem:[#allocation50_spill] sm:$0xff] }
  0x88   : > { %4546 = vmatprep.mubr.f32.mxu0 %v6971_v8  ;;  %v6992_v8 = vld [vmem:[#allocation49_spill] sm:$0xff] }
  0x89   : > { %4600 = vmatmul.mubr.f32.gmra.mxu1 %v5498_v57  ;;  %v6991_v57 = vld [vmem:[#allocation47_spill] sm:$0xff] }
  0x8a   : > { %4602 = vmatprep.mubr.f32.mxu1 %v5512_v40  ;;  %v6990_v40 = vld [vmem:[#allocation38_spill] sm:$0xff] }
  0x8b   : > { %4547 = vmatmul.mubr.f32.gmra.mxu0 %v6972_v2  ;;  %v6975_v2 = vld [vmem:[#allocation2_spill] sm:$0xff] }
  0x8c   : > { %4549 = vmatprep.mubr.f32.mxu0 %v6973_v18  ;;  %v6989_v18 = vld [vmem:[#allocation37_spill] sm:$0xff] }
  0x8d   : > { %4603 = vmatmul.mubr.f32.gmra.mxu1 %v5531_v62  ;;  %v6988_v62 = vld [vmem:[#allocation30_spill] sm:$0xff] }
  0x8e   : > { %4605 = vmatprep.mubr.f32.mxu1 %v5546_v59  ;;  %v6976_v59 = vld [vmem:[#allocation3_spill] sm:$0xff] }
  0x8f   : > { %4550 = vmatmul.mubr.f32.gmra.mxu0 %v5467_v23  ;;  %v6987_v23 = vld [vmem:[#allocation28_spill] sm:$0xff] }
  0x90   : > { %4552 = vmatprep.mubr.f32.mxu0 %v6974_v9  ;;  %v6977_v9 = vld [vmem:[#allocation4_spill] sm:$0xff] }
  0x91   : > { %4606 = vmatmul.mubr.f32.gmra.mxu1 %v5559_v19  ;;  %v6986_v19 = vld [vmem:[#allocation24_spill] sm:$0xff] }
  0x92   : > { %4608 = vmatprep.mubr.f32.mxu1 %v5573_v4  ;;  %v6985_v4 = vld [vmem:[#allocation23_spill] sm:$0xff] }
  0x93   : > { %4553 = vmatmul.mubr.f32.gmra.mxu0 %v5506_v14  ;;  %v6984_v14 = vld [vmem:[#allocation22_spill] sm:$0xff] }
  0x94   : > { %4555 = vmatprep.mubr.f32.mxu0 %v5515_v11  ;;  %v6978_v11 = vld [vmem:[#allocation5_spill] sm:$0xff] }
  0x95   : > { %4609 = vmatmul.mubr.f32.gmra.mxu1 %v5583_v42  ;;  %v6979_v42 = vld [vmem:[#allocation6_spill] sm:$0xff] }
  0x96   : > { %4663 = vmatprep.mubr.f32.mxu1 %v6975_v2 }
  0x97   : > { %4556 = vmatmul.mubr.f32.gmra.mxu0 %v5534_v7  ;;  %v6983_v7 = vld [vmem:[#allocation21_spill] sm:$0xff] }
  0x98   : > { %4558 = vmatprep.mubr.f32.mxu0 %v5549_v13  ;;  %v6980_v13 = vld [vmem:[#allocation7_spill] sm:$0xff] }
  0x99   : > { %4664 = vmatmul.mubr.f32.vlgmr.msra.gmra.mxu1 %v6976_v59 }
  0x9a   : > { %4762 = vmatpush3.msra.mxu1 %v5610_v51  ;;  %4666 = vmatprep.mubr.f32.mxu1 %v6977_v9  ;;  %v6981_v51 = vld [vmem:[#allocation8_spill] sm:$0xff] }
  0x9b   : > { %4559 = vmatmul.mubr.f32.gmra.mxu0 %v5562_v60  ;;  %4861 = vmatprep.subr.mxu1 %v5538_v52  ;;  %v6982_v60 = vld [vmem:[#allocation11_spill] sm:$0xff] }
  0x9c   : > { %4613 = vmatprep.mubr.f32.mxu0 %v6975_v2 }
  0x9d   : > { %4667 = vmatmul.mubr.f32.gmra.mxu1 %v6978_v11 }
  0x9e   : > { %4669 = vmatprep.mubr.f32.mxu1 %v6979_v42 }
  0x9f   : > { %4614 = vmatmul.mubr.f32.vlgmr.msra.gmra.mxu0 %v6976_v59 }
  0xa0   : > { %4712 = vmatpush3.msra.mxu0 %v5538_v52  ;;  %4616 = vmatprep.mubr.f32.mxu0 %v6977_v9 }
  0xa1   : > { %4670 = vmatmul.mubr.f32.gmra.mxu1 %v6980_v13  ;;  %4811 = vmatprep.subr.mxu0 %v5565_v29 }
  0xa2   : > { %4672 = vmatprep.mubr.f32.mxu1 %v6981_v51 }
  0xa3   : > { %4617 = vmatmul.mubr.f32.gmra.mxu0 %v6978_v11 }
  0xa4   : > { %4619 = vmatprep.mubr.f32.mxu0 %v6979_v42 }
  0xa5   : > { %4673 = vmatmul.mubr.f32.gmra.mxu1 %v6982_v60 }
  0xa6   : > { %4675 = vmatprep.mubr.f32.mxu1 %v6983_v7 }
  0xa7   : > { %4620 = vmatmul.mubr.f32.gmra.mxu0 %v6980_v13 }
  0xa8   : > { %4622 = vmatprep.mubr.f32.mxu0 %v6981_v51 }
  0xa9   : > { %4676 = vmatmul.mubr.f32.gmra.mxu1 %v6984_v14 }
  0xaa   : > { %4678 = vmatprep.mubr.f32.mxu1 %v6985_v4 }
  0xab   : > { %4623 = vmatmul.mubr.f32.gmra.mxu0 %v6982_v60 }
  0xac   : > { %4625 = vmatprep.mubr.f32.mxu0 %v6983_v7 }
  0xad   : > { %4679 = vmatmul.mubr.f32.gmra.mxu1 %v6986_v19 }
  0xae   : > { %4681 = vmatprep.mubr.f32.mxu1 %v6987_v23 }
  0xaf   : > { %4626 = vmatmul.mubr.f32.gmra.mxu0 %v6984_v14 }
  0xb0   : > { %4628 = vmatprep.mubr.f32.mxu0 %v6985_v4 }
  0xb1   : > { %4682 = vmatmul.mubr.f32.gmra.mxu1 %v6988_v62 }
  0xb2   : > { %4684 = vmatprep.mubr.f32.mxu1 %v6989_v18 }
  0xb3   : > { %4629 = vmatmul.mubr.f32.gmra.mxu0 %v6986_v19 }
  0xb4   : > { %4631 = vmatprep.mubr.f32.mxu0 %v6987_v23 }
  0xb5   : > { %4685 = vmatmul.mubr.f32.gmra.mxu1 %v6990_v40 }
  0xb6   : > { %4687 = vmatprep.mubr.f32.mxu1 %v6991_v57 }
  0xb7   : > { %4632 = vmatmul.mubr.f32.gmra.mxu0 %v6988_v62 }
  0xb8   : > { %4634 = vmatprep.mubr.f32.mxu0 %v6989_v18 }
  0xb9   : > { %4688 = vmatmul.mubr.f32.gmra.mxu1 %v6992_v8 }
  0xba   : > { %4690 = vmatprep.mubr.f32.mxu1 %v6993_v39 }
  0xbb   : > { %4635 = vmatmul.mubr.f32.gmra.mxu0 %v6990_v40 }
  0xbc   : > { %4637 = vmatprep.mubr.f32.mxu0 %v6991_v57 }
  0xbd   : > { %4691 = vmatmul.mubr.f32.gmra.mxu1 %v6994_v41 }
  0xbe   : > { %4693 = vmatprep.mubr.f32.mxu1 %v6995_v1 }
  0xbf   : > { %4638 = vmatmul.mubr.f32.gmra.mxu0 %v6992_v8 }
  0xc0   : > { %4640 = vmatprep.mubr.f32.mxu0 %v6993_v39 }
  0xc1   : > { %4694 = vmatmul.mubr.f32.gmra.mxu1 %v6996_v0 }
  0xc2   : > { %4696 = vmatprep.mubr.f32.mxu1 %v6997_v56 }
  0xc3   : > { %4641 = vmatmul.mubr.f32.gmra.mxu0 %v6994_v41 }
  0xc4   : > { %4643 = vmatprep.mubr.f32.mxu0 %v6995_v1 }
  0xc5   : > { %4697 = vmatmul.mubr.f32.gmra.mxu1 %v6998_v54 }
  0xc6   : > { %4699 = vmatprep.mubr.f32.mxu1 %v6999_v27 }
  0xc7   : > { %4644 = vmatmul.mubr.f32.gmra.mxu0 %v6996_v0 }
  0xc8   : > { %4646 = vmatprep.mubr.f32.mxu0 %v6997_v56 }
  0xc9   : > { %4700 = vmatmul.mubr.f32.gmra.mxu1 %v7000_v3 }
  0xca   : > { %4702 = vmatprep.mubr.f32.mxu1 %v7001_v31 }
  0xcb   : > { %4647 = vmatmul.mubr.f32.gmra.mxu0 %v6998_v54 }
  0xcc   : > { %4649 = vmatprep.mubr.f32.mxu0 %v6999_v27 }
  0xcd   : > { %4703 = vmatmul.mubr.f32.gmra.mxu1 %v7002_v10 }
  0xce   : > { %4705 = vmatprep.mubr.f32.mxu1 %v7003_v6 }
  0xcf   : > { %4650 = vmatmul.mubr.f32.gmra.mxu0 %v7000_v3 }
  0xd0   : > { %4652 = vmatprep.mubr.f32.mxu0 %v7001_v31 }
  0xd1   : > { %4706 = vmatmul.mubr.f32.gmra.mxu1 %v5508_v15 }
  0xd2   : > { %4708 = vmatprep.mubr.f32.mxu1 %v5517_v30 }
  0xd3   : > { %4653 = vmatmul.mubr.f32.gmra.mxu0 %v7002_v10 }
  0xd4   : > { %4655 = vmatprep.mubr.f32.mxu0 %v7003_v6 }
  0xd5   : > { %4709 = vmatmul.mubr.f32.gmra.mxu1 %v5536_v12 }
  0xd6   : > { %4763 = vmatprep.mubr.f32.mxu1 %v6975_v2  ;;  %v5758_v2 = vld [vmem:[%s6667_s2] ss:$0 sm:$0xff] }
  0xd7   : > { %4656 = vmatmul.mubr.f32.gmra.mxu0 %v5508_v15 }
  0xd8   : > { %4658 = vmatprep.mubr.f32.mxu0 %v5517_v30  ;;  %v4465_v22 = vpop.f32.mrf.mxu1 }
  0xd9   : > { %4764 = vmatmul.mubr.f32.vlgmr.msra.gmra.mxu1 %v6976_v59 }
  0xda   : > { %v769_v21 = vpop.f32.mrf.mxu1  ;;  %4862 = vmatpush3.msra.mxu1 %v5538_v52  ;;  %4766 = vmatprep.mubr.f32.mxu1 %v6977_v9 }
  0xdb   : > { %4659 = vmatmul.mubr.f32.gmra.mxu0 %v5536_v12  ;;  %4961 = vmatprep.subr.mxu1 %v5538_v52 }
  0xdc   : > { %4713 = vmatprep.mubr.f32.mxu0 %v7004_v63  ;;  %v4468_v55 = vpop.f32.mrf.mxu1 }
  0xdd   : > { %4767 = vmatmul.mubr.f32.gmra.mxu1 %v6978_v11 }
  0xde   : > { %v781_v59 = vpop.f32.mrf.mxu1  ;;  %4769 = vmatprep.mubr.f32.mxu1 %v6979_v42 }
  0xdf   : > { %v4415_v20 = vpop.f32.mrf.mxu0  ;;  %4714 = vmatmul.mubr.f32.vlgmr.msra.gmra.mxu0 %v7005_v47  ;;  %v7007_v47 = vld [vmem:[#allocation17_spill] sm:$0xff] }
  0xe0   : > { %v394_v9 = vadd.f32 %v4415_v20, %v5758_v2  ;;  %4812 = vmatpush3.msra.mxu0 %v5565_v29  ;;  %4716 = vmatprep.mubr.f32.mxu0 %v7006_v50  ;;  %v7008_v29 = vld [vmem:[#allocation18_spill] sm:$0xff] }
  0xe1   : > { %v383_v63 = vpop.f32.mrf.mxu0  ;;  %v4471_v49 = vpop.f32.mrf.mxu1  ;;  %4770 = vmatmul.mubr.f32.gmra.mxu1 %v6980_v13  ;;  %4911 = vmatprep.subr.mxu0 %v5586_v16 }
  0xe2   : > { %v5768_v38 = vadd.f32 %v4465_v22, %v394_v9  ;;  %v384_v11 = vadd.f32 %v5758_v2, %v383_v63  ;;  %4772 = vmatprep.mubr.f32.mxu1 %v6981_v51  ;;  %v7009_v51 = vld [vmem:[#allocation19_spill] sm:$0xff] }
  0xe3   : > { %v4418_v42 = vpop.f32.mrf.mxu0  ;;  %4717 = vmatmul.mubr.f32.gmra.mxu0 %v7007_v47  ;;  %v793_v20 = vpop.f32.mrf.mxu1 }
  0xe4   : > { %v5773_v37 = vadd.f32 %v769_v21, %v384_v11  ;;  %v414_v50 = vadd.f32 %v4418_v42, %v5758_v2  ;;  %4719 = vmatprep.mubr.f32.mxu0 %v7008_v29  ;;  %v7010_v42 = vld [vmem:[#allocation20_spill] sm:$0xff] }
  0xe5   : > { %v403_v48 = vpop.f32.mrf.mxu0  ;;  %v4474_v13 = vpop.f32.mrf.mxu1  ;;  %4773 = vmatmul.mubr.f32.gmra.mxu1 %v6982_v60 }
  0xe6   : > { %v5778_v22 = vadd.f32 %v4468_v55, %v414_v50  ;;  %v404_v9 = vadd.f32 %v5758_v2, %v403_v48  ;;  %4775 = vmatprep.mubr.f32.mxu1 %v6983_v7  ;;  %v7011_v7 = vld [vmem:[#allocation39_spill] sm:$0xff] }
  0xe7   : > { %v4421_v63 = vpop.f32.mrf.mxu0  ;;  %4720 = vmatmul.mubr.f32.gmra.mxu0 %v7009_v51  ;;  %v805_v47 = vpop.f32.mrf.mxu1 }
  0xe8   : > { %v5783_v21 = vadd.f32 %v781_v59, %v404_v9  ;;  %v434_v11 = vadd.f32 %v4421_v63, %v5758_v2  ;;  %4722 = vmatprep.mubr.f32.mxu0 %v7010_v42  ;;  %v7012_v63 = vld [vmem:[#allocation42_spill] sm:$0xff] }
  0xe9   : > { %v423_v29 = vpop.f32.mrf.mxu0  ;;  %v4477_v58 = vpop.f32.mrf.mxu1  ;;  %4776 = vmatmul.mubr.f32.gmra.mxu1 %v6984_v14 }
  0xea   : > { %v5788_v55 = vadd.f32 %v4471_v49, %v434_v11  ;;  %v424_v48 = vadd.f32 %v5758_v2, %v423_v29  ;;  %4778 = vmatprep.mubr.f32.mxu1 %v6985_v4  ;;  %v7013_v4 = vld [vmem:[#allocation45_spill] sm:$0xff] }
  0xeb   : > { %v4424_v50 = vpop.f32.mrf.mxu0  ;;  %4723 = vmatmul.mubr.f32.gmra.mxu0 %v7011_v7  ;;  %v817_v51 = vpop.f32.mrf.mxu1 }
  0xec   : > { %v5793_v59 = vadd.f32 %v793_v20, %v424_v48  ;;  %v454_v9 = vadd.f32 %v4424_v50, %v5758_v2  ;;  %4725 = vmatprep.mubr.f32.mxu0 %v7012_v63  ;;  %v7014_v50 = vld [vmem:[#allocation48_spill] sm:$0xff] }
  0xed   : > { %v443_v42 = vpop.f32.mrf.mxu0  ;;  %v4480_v60 = vpop.f32.mrf.mxu1  ;;  %4779 = vmatmul.mubr.f32.gmra.mxu1 %v6986_v19 }
  0xee   : > { %v5798_v49 = vadd.f32 %v4474_v13, %v454_v9  ;;  %v444_v11 = vadd.f32 %v5758_v2, %v443_v42  ;;  %4781 = vmatprep.mubr.f32.mxu1 %v6987_v23  ;;  %v7015_v23 = vld [vmem:[#allocation52_spill] sm:$0xff] }
  0xef   : > { %v4427_v29 = vpop.f32.mrf.mxu0  ;;  %4726 = vmatmul.mubr.f32.gmra.mxu0 %v7013_v4  ;;  %v829_v7 = vpop.f32.mrf.mxu1 }
  0xf0   : > { %v5803_v20 = vadd.f32 %v805_v47, %v444_v11  ;;  %v474_v48 = vadd.f32 %v4427_v29, %v5758_v2  ;;  %4728 = vmatprep.mubr.f32.mxu0 %v7014_v50  ;;  %v7016_v29 = vld [vmem:[#allocation55_spill] sm:$0xff] }
  0xf1   : > { %v463_v63 = vpop.f32.mrf.mxu0  ;;  %v4483_v14 = vpop.f32.mrf.mxu1  ;;  %4782 = vmatmul.mubr.f32.gmra.mxu1 %v6988_v62 }
  0xf2   : > { %v5808_v13 = vadd.f32 %v4477_v58, %v474_v48  ;;  %v464_v9 = vadd.f32 %v5758_v2, %v463_v63  ;;  %4784 = vmatprep.mubr.f32.mxu1 %v6989_v18  ;;  %v7017_v18 = vld [vmem:[#allocation62_spill] sm:$0xff] }
  0xf3   : > { %v4430_v42 = vpop.f32.mrf.mxu0  ;;  %4729 = vmatmul.mubr.f32.gmra.mxu0 %v7015_v23  ;;  %v841_v4 = vpop.f32.mrf.mxu1 }
  0xf4   : > { %v5813_v47 = vadd.f32 %v817_v51, %v464_v9  ;;  %v494_v11 = vadd.f32 %v4430_v42, %v5758_v2  ;;  %4731 = vmatprep.mubr.f32.mxu0 %v7016_v29  ;;  %v7018_v42 = vld [vmem:[#allocation65_spill] sm:$0xff] }
  0xf5   : > { %v483_v50 = vpop.f32.mrf.mxu0  ;;  %v4486_v19 = vpop.f32.mrf.mxu1  ;;  %4785 = vmatmul.mubr.f32.gmra.mxu1 %v6990_v40 }
  0xf6   : > { %v5818_v58 = vadd.f32 %v4480_v60, %v494_v11  ;;  %v484_v48 = vadd.f32 %v5758_v2, %v483_v50  ;;  %4787 = vmatprep.mubr.f32.mxu1 %v6991_v57  ;;  %v7019_v57 = vld [vmem:[#allocation68_spill] sm:$0xff] }
  0xf7   : > { %v4433_v63 = vpop.f32.mrf.mxu0  ;;  %4732 = vmatmul.mubr.f32.gmra.mxu0 %v7017_v18  ;;  %v853_v23 = vpop.f32.mrf.mxu1 }
  0xf8   : > { %v5823_v51 = vadd.f32 %v829_v7, %v484_v48  ;;  %v514_v9 = vadd.f32 %v4433_v63, %v5758_v2  ;;  %4734 = vmatprep.mubr.f32.mxu0 %v7018_v42  ;;  %v7020_v63 = vld [vmem:[#allocation74_spill] sm:$0xff] }
  0xf9   : > { %v503_v29 = vpop.f32.mrf.mxu0  ;;  %v4489_v62 = vpop.f32.mrf.mxu1  ;;  %4788 = vmatmul.mubr.f32.gmra.mxu1 %v6992_v8 }
  0xfa   : > { %v5828_v60 = vadd.f32 %v4483_v14, %v514_v9  ;;  %v504_v11 = vadd.f32 %v5758_v2, %v503_v29  ;;  %4790 = vmatprep.mubr.f32.mxu1 %v6993_v39  ;;  %v7021_v39 = vld [vmem:[#allocation79_spill] sm:$0xff] }
  0xfb   : > { %v4436_v50 = vpop.f32.mrf.mxu0  ;;  %4735 = vmatmul.mubr.f32.gmra.mxu0 %v7019_v57  ;;  %v865_v18 = vpop.f32.mrf.mxu1 }
  0xfc   : > { %v5833_v7 = vadd.f32 %v841_v4, %v504_v11  ;;  %v534_v48 = vadd.f32 %v4436_v50, %v5758_v2  ;;  %4737 = vmatprep.mubr.f32.mxu0 %v7020_v63  ;;  %v7022_v50 = vld [vmem:[#allocation82_spill] sm:$0xff] }
  0xfd   : > { %v523_v42 = vpop.f32.mrf.mxu0  ;;  %v4492_v40 = vpop.f32.mrf.mxu1  ;;  %4791 = vmatmul.mubr.f32.gmra.mxu1 %v6994_v41 }
  0xfe   : > { %v5838_v14 = vadd.f32 %v4486_v19, %v534_v48  ;;  %v524_v9 = vadd.f32 %v5758_v2, %v523_v42  ;;  %4793 = vmatprep.mubr.f32.mxu1 %v6995_v1  ;;  %v7023_v1 = vld [vmem:[#allocation86_spill] sm:$0xff] }
  0xff   : > { %v4439_v29 = vpop.f32.mrf.mxu0  ;;  %4738 = vmatmul.mubr.f32.gmra.mxu0 %v7021_v39  ;;  %v877_v57 = vpop.f32.mrf.mxu1 }
 0x100   : > { %v5843_v4 = vadd.f32 %v853_v23, %v524_v9  ;;  %v554_v11 = vadd.f32 %v4439_v29, %v5758_v2  ;;  %4740 = vmatprep.mubr.f32.mxu0 %v7022_v50  ;;  %v7024_v29 = vld [vmem:[#allocation89_spill] sm:$0xff] }
 0x101   : > { %v543_v63 = vpop.f32.mrf.mxu0  ;;  %v4495_v8 = vpop.f32.mrf.mxu1  ;;  %4794 = vmatmul.mubr.f32.gmra.mxu1 %v6996_v0 }
 0x102   : > { %v5848_v19 = vadd.f32 %v4489_v62, %v554_v11  ;;  %v544_v48 = vadd.f32 %v5758_v2, %v543_v63  ;;  %4796 = vmatprep.mubr.f32.mxu1 %v6997_v56  ;;  %v7025_v56 = vld [vmem:[#allocation92_spill] sm:$0xff] }
 0x103   : > { %v4442_v42 = vpop.f32.mrf.mxu0  ;;  %4741 = vmatmul.mubr.f32.gmra.mxu0 %v7023_v1  ;;  %v889_v39 = vpop.f32.mrf.mxu1 }
 0x104   : > { %v5853_v23 = vadd.f32 %v865_v18, %v544_v48  ;;  %v574_v9 = vadd.f32 %v4442_v42, %v5758_v2  ;;  %4743 = vmatprep.mubr.f32.mxu0 %v7024_v29  ;;  %v7026_v42 = vld [vmem:[#allocation94_spill] sm:$0xff] }
 0x105   : > { %v563_v50 = vpop.f32.mrf.mxu0  ;;  %v4498_v41 = vpop.f32.mrf.mxu1  ;;  %4797 = vmatmul.mubr.f32.gmra.mxu1 %v6998_v54 }
 0x106   : > { %v5858_v62 = vadd.f32 %v4492_v40, %v574_v9  ;;  %v564_v11 = vadd.f32 %v5758_v2, %v563_v50  ;;  %4799 = vmatprep.mubr.f32.mxu1 %v6999_v27  ;;  %v7027_v27 = vld [vmem:[#allocation98_spill] sm:$0xff] }
 0x107   : > { %v4445_v63 = vpop.f32.mrf.mxu0  ;;  %4744 = vmatmul.mubr.f32.gmra.mxu0 %v7025_v56  ;;  %v901_v1 = vpop.f32.mrf.mxu1 }
 0x108   : > { %v5863_v18 = vadd.f32 %v877_v57, %v564_v11  ;;  %v594_v48 = vadd.f32 %v4445_v63, %v5758_v2  ;;  %4746 = vmatprep.mubr.f32.mxu0 %v7026_v42  ;;  %v7028_v63 = vld [vmem:[#allocation101_spill] sm:$0xff] }
 0x109   : > { %v583_v29 = vpop.f32.mrf.mxu0  ;;  %v4501_v0 = vpop.f32.mrf.mxu1  ;;  %4800 = vmatmul.mubr.f32.gmra.mxu1 %v7000_v3 }
 0x10a   : > { %v5868_v40 = vadd.f32 %v4495_v8, %v594_v48  ;;  %v584_v9 = vadd.f32 %v5758_v2, %v583_v29  ;;  %4802 = vmatprep.mubr.f32.mxu1 %v7001_v31  ;;  %v7029_v31 = vld [vmem:[#allocation104_spill] sm:$0xff] }
 0x10b   : > { %v4448_v50 = vpop.f32.mrf.mxu0  ;;  %4747 = vmatmul.mubr.f32.gmra.mxu0 %v7027_v27  ;;  %v913_v56 = vpop.f32.mrf.mxu1 }
 0x10c   : > { %v5873_v57 = vadd.f32 %v889_v39, %v584_v9  ;;  %v614_v11 = vadd.f32 %v4448_v50, %v5758_v2  ;;  %4749 = vmatprep.mubr.f32.mxu0 %v7028_v63  ;;  %v7030_v50 = vld [vmem:[#allocation107_spill] sm:$0xff] }
 0x10d   : > { %v603_v42 = vpop.f32.mrf.mxu0  ;;  %v4504_v54 = vpop.f32.mrf.mxu1  ;;  %4803 = vmatmul.mubr.f32.gmra.mxu1 %v7002_v10 }
 0x10e   : > { %v5878_v8 = vadd.f32 %v4498_v41, %v614_v11  ;;  %v604_v48 = vadd.f32 %v5758_v2, %v603_v42  ;;  %4805 = vmatprep.mubr.f32.mxu1 %v7003_v6 }
 0x10f   : > { %v4451_v29 = vpop.f32.mrf.mxu0  ;;  %4750 = vmatmul.mubr.f32.gmra.mxu0 %v7029_v31  ;;  %v925_v27 = vpop.f32.mrf.mxu1 }
 0x110   : > { %v5883_v39 = vadd.f32 %v901_v1, %v604_v48  ;;  %v634_v9 = vadd.f32 %v4451_v29, %v5758_v2  ;;  %4752 = vmatprep.mubr.f32.mxu0 %v7030_v50 }
 0x111   : > { %v623_v63 = vpop.f32.mrf.mxu0  ;;  %v4507_v3 = vpop.f32.mrf.mxu1  ;;  %4806 = vmatmul.mubr.f32.gmra.mxu1 %v5508_v15 }
 0x112   : > { %v5888_v41 = vadd.f32 %v4501_v0, %v634_v9  ;;  %v624_v11 = vadd.f32 %v5758_v2, %v623_v63  ;;  %4808 = vmatprep.mubr.f32.mxu1 %v5517_v30 }
 0x113   : > { %v4454_v42 = vpop.f32.mrf.mxu0  ;;  %4753 = vmatmul.mubr.f32.gmra.mxu0 %v5578_v17  ;;  %v937_v31 = vpop.f32.mrf.mxu1 }
 0x114   : > { %v5893_v1 = vadd.f32 %v913_v56, %v624_v11  ;;  %v654_v48 = vadd.f32 %v4454_v42, %v5758_v2  ;;  %4755 = vmatprep.mubr.f32.mxu0 %v5589_v61 }
 0x115   : > { %v643_v29 = vpop.f32.mrf.mxu0  ;;  %v4510_v50 = vpop.f32.mrf.mxu1  ;;  %4809 = vmatmul.mubr.f32.gmra.mxu1 %v5536_v12 }
 0x116   : > { %v5898_v0 = vadd.f32 %v4504_v54, %v654_v48  ;;  %v644_v9 = vadd.f32 %v5758_v2, %v643_v29  ;;  %4863 = vmatprep.mubr.f32.mxu1 %v5122_v32 }
 0x117   : > { %v4457_v63 = vpop.f32.mrf.mxu0  ;;  %4756 = vmatmul.mubr.f32.gmra.mxu0 %v5596_v28  ;;  %v949_v17 = vpop.f32.mrf.mxu1 }
 0x118   : > { %v5903_v56 = vadd.f32 %v925_v27, %v644_v9  ;;  %v674_v11 = vadd.f32 %v4457_v63, %v5758_v2  ;;  %4758 = vmatprep.mubr.f32.mxu0 %v5603_v5 }
 0x119   : > { %v663_v61 = vpop.f32.mrf.mxu0  ;;  %v4565_v42 = vpop.f32.mrf.mxu1  ;;  %4864 = vmatmul.mubr.f32.vlgmr.msra.gmra.mxu1 %v5125_v33 }
 0x11a   : > { %v5908_v54 = vadd.f32 %v4507_v3, %v674_v11  ;;  %v664_v48 = vadd.f32 %v5758_v2, %v663_v61  ;;  %4962 = vmatpush3.msra.mxu1 %v5538_v52  ;;  %4866 = vmatprep.mubr.f32.mxu1 %v5130_v34  ;;  %v7032_v11 = vld [vmem:[#allocation31_spill] sm:$0xff]  ;;  %v7033_v61 = vld [vmem:[#allocation9_spill] sm:$0xff] }
 0x11b   : > { %v4460_v32 = vpop.f32.mrf.mxu0  ;;  %4759 = vmatmul.mubr.f32.gmra.mxu0 %v5608_v53  ;;  %v1320_v28 = vpop.f32.mrf.mxu1 }
 0x11c   : > { %v5914_v27 = vadd.f32 %v937_v31, %v664_v48  ;;  %v694_v5 = vadd.f32 %v4460_v32, %v5758_v2  ;;  %4813 = vmatprep.mubr.f32.mxu0 %v5103_v24  ;;  %v7034_v48 = vld [vmem:[#allocation10_spill] sm:$0xff] }
 0x11d   : > { %v683_v29 = vpop.f32.mrf.mxu0  ;;  %v4568_v33 = vpop.f32.mrf.mxu1  ;;  %4867 = vmatmul.mubr.f32.gmra.mxu1 %v5155_v43 }
 0x11e   : > { %v5919_v3 = vadd.f32 %v4510_v50, %v694_v5  ;;  %v684_v52 = vadd.f32 %v5758_v2, %v683_v29  ;;  %4869 = vmatprep.mubr.f32.mxu1 %v5159_v44  ;;  %v7036_v29 = vld [vmem:[#allocation33_spill] sm:$0xff] }
 0x11f   : > { %v4515_v34 = vpop.f32.mrf.mxu0  ;;  %4814 = vmatmul.mubr.f32.vlgmr.msra.gmra.mxu0 %v5107_v25  ;;  %v1336_v53 = vpop.f32.mrf.mxu1 }
 0x120   : > { %v5924_v31 = vadd.f32 %v949_v17, %v684_v52  ;;  %v1037_v9 = vadd.f32 %v4515_v34, %v5768_v38  ;;  %4912 = vmatpush3.msra.mxu0 %v5586_v16  ;;  %4816 = vmatprep.mubr.f32.mxu0 %v5110_v26  ;;  %v7031_v17 = vld [vmem:[#allocation16_spill] sm:$0xff] }
 0x121   : > { %v1029_v24 = vpop.f32.mrf.mxu0  ;;  %v4571_v43 = vpop.f32.mrf.mxu1  ;;  %4870 = vmatmul.mubr.f32.gmra.mxu1 %v5162_v45  ;;  %v7037_v52 = vld [vmem:[#allocation12_spill] sm:$0xff] }
 0x122   : > { %v5930_v50 = vadd.f32 %v4565_v42, %v1037_v9  ;;  %v1030_v44 = vadd.f32 %v1029_v24, %v5773_v37  ;;  %4872 = vmatprep.mubr.f32.mxu1 %v5165_v46  ;;  %v7038_v9 = vld [vmem:[#allocation25_spill] sm:$0xff] }
 0x123   : > { %v4518_v25 = vpop.f32.mrf.mxu0  ;;  %4817 = vmatmul.mubr.f32.gmra.mxu0 %v5133_v35  ;;  %v1352_v2 = vpop.f32.mrf.mxu1 }
 0x124   : > { %v5935_v63 = vadd.f32 %v1320_v28, %v1030_v44  ;;  %v1051_v38 = vadd.f32 %v4518_v25, %v5778_v22  ;;  %4819 = vmatprep.mubr.f32.mxu0 %v5138_v36  ;;  %v7035_v28 = vld [vmem:[#allocation32_spill] sm:$0xff]  ;;  %v7039_v25 = vld [vmem:[#allocation35_spill] sm:$0xff] }
 0x125   : > { %v1043_v26 = vpop.f32.mrf.mxu0  ;;  %v4574_v16 = vpop.f32.mrf.mxu1  ;;  %4873 = vmatmul.mubr.f32.gmra.mxu1 %v7031_v17  ;;  %v7041_v17 = vld [vmem:[#allocation26_spill] sm:$0xff] }
 0x126   : > { %v5940_v45 = vadd.f32 %v4568_v33, %v1051_v38  ;;  %v1044_v37 = vadd.f32 %v1043_v26, %v5783_v21  ;;  %4875 = vmatprep.mubr.f32.mxu1 %v7032_v11  ;;  %v7040_v38 = vld [vmem:[#allocation40_spill] sm:$0xff]  ;;  %v7042_v11 = vld [vmem:[#allocation27_spill] sm:$0xff] }
 0x127   : > { %v4521_v46 = vpop.f32.mrf.mxu0  ;;  %4820 = vmatmul.mubr.f32.gmra.mxu0 %v7033_v61  ;;  %v1368_v35 = vpop.f32.mrf.mxu1 }
 0x128   : > { %v5945_v42 = vadd.f32 %v1336_v53, %v1044_v37  ;;  %v1065_v22 = vadd.f32 %v4521_v46, %v5788_v55  ;;  %4822 = vmatprep.mubr.f32.mxu0 %v7034_v48  ;;  %v7044_v48 = vld [vmem:[#allocation46_spill] sm:$0xff] }
 0x129   : > { %v1057_v36 = vpop.f32.mrf.mxu0  ;;  %v4577_v32 = vpop.f32.mrf.mxu1  ;;  %4876 = vmatmul.mubr.f32.gmra.mxu1 %v7035_v28  ;;  %v7045_v28 = vld [vmem:[#allocation29_spill] sm:$0xff] }
 0x12a   : > { %v5950_v5 = vadd.f32 %v4571_v43, %v1065_v22  ;;  %v1058_v21 = vadd.f32 %v1057_v36, %v5793_v59  ;;  %4878 = vmatprep.mubr.f32.mxu1 %v7036_v29  ;;  %v7043_v22 = vld [vmem:[#allocation43_spill] sm:$0xff]  ;;  %v7046_v29 = vld [vmem:[#allocation34_spill] sm:$0xff] }
 0x12b   : > { %v4524_v33 = vpop.f32.mrf.mxu0  ;;  %4823 = vmatmul.mubr.f32.gmra.mxu0 %v7037_v52  ;;  %v1384_v34 = vpop.f32.mrf.mxu1 }
 0x12c   : > { %v5955_v53 = vadd.f32 %v1352_v2, %v1058_v21  ;;  %v1079_v55 = vadd.f32 %v4524_v33, %v5798_v49  ;;  %4825 = vmatprep.mubr.f32.mxu0 %v7038_v9  ;;  %v7048_v9 = vld [vmem:[#allocation57_spill] sm:$0xff] }
 0x12d   : > { %v1071_v24 = vpop.f32.mrf.mxu0  ;;  %v4580_v44 = vpop.f32.mrf.mxu1  ;;  %4879 = vmatmul.mubr.f32.gmra.mxu1 %v7039_v25  ;;  %v7049_v25 = vld [vmem:[#allocation36_spill] sm:$0xff] }
 0x12e   : > { %v5960_v43 = vadd.f32 %v4574_v16, %v1079_v55  ;;  %v1072_v59 = vadd.f32 %v1071_v24, %v5803_v20  ;;  %4881 = vmatprep.mubr.f32.mxu1 %v7040_v38  ;;  %v7047_v55 = vld [vmem:[#allocation53_spill] sm:$0xff] }
 0x12f   : > { %v4527_v26 = vpop.f32.mrf.mxu0  ;;  %4826 = vmatmul.mubr.f32.gmra.mxu0 %v7041_v17  ;;  %v1400_v37 = vpop.f32.mrf.mxu1  ;;  %v7050_v38 = vld [vmem:[#allocation41_spill] sm:$0xff] }
 0x130   : > { %v5965_v2 = vadd.f32 %v1368_v35, %v1072_v59  ;;  %v1093_v49 = vadd.f32 %v4527_v26, %v5808_v13  ;;  %4828 = vmatprep.mubr.f32.mxu0 %v7042_v11  ;;  %v7052_v11 = vld [vmem:[#allocation66_spill] sm:$0xff] }
 0x131   : > { %v1085_v46 = vpop.f32.mrf.mxu0  ;;  %v4583_v61 = vpop.f32.mrf.mxu1  ;;  %4882 = vmatmul.mubr.f32.gmra.mxu1 %v7043_v22  ;;  %v7053_v22 = vld [vmem:[#allocation44_spill] sm:$0xff] }
 0x132   : > { %v5970_v16 = vadd.f32 %v4577_v32, %v1093_v49  ;;  %v1086_v20 = vadd.f32 %v1085_v46, %v5813_v47  ;;  %4884 = vmatprep.mubr.f32.mxu1 %v7044_v48  ;;  %v7051_v49 = vld [vmem:[#allocation63_spill] sm:$0xff] }
 0x133   : > { %v4530_v36 = vpop.f32.mrf.mxu0  ;;  %4829 = vmatmul.mubr.f32.gmra.mxu0 %v7045_v28  ;;  %v1416_v21 = vpop.f32.mrf.mxu1  ;;  %v7054_v48 = vld [vmem:[#allocation51_spill] sm:$0xff] }
 0x134   : > { %v5975_v35 = vadd.f32 %v1384_v34, %v1086_v20  ;;  %v1107_v13 = vadd.f32 %v4530_v36, %v5818_v58  ;;  %4831 = vmatprep.mubr.f32.mxu0 %v7046_v29  ;;  %v7056_v29 = vld [vmem:[#allocation75_spill] sm:$0xff] }
 0x135   : > { %v1099_v33 = vpop.f32.mrf.mxu0  ;;  %v4586_v52 = vpop.f32.mrf.mxu1  ;;  %4885 = vmatmul.mubr.f32.gmra.mxu1 %v7047_v55  ;;  %v7057_v55 = vld [vmem:[#allocation56_spill] sm:$0xff] }
 0x136   : > { %v5980_v32 = vadd.f32 %v4580_v44, %v1107_v13  ;;  %v1100_v47 = vadd.f32 %v1099_v33, %v5823_v51  ;;  %4887 = vmatprep.mubr.f32.mxu1 %v7048_v9  ;;  %v7055_v13 = vld [vmem:[#allocation69_spill] sm:$0xff]  ;;  %v7058_v9 = vld [vmem:[#allocation58_spill] sm:$0xff] }
 0x137   : > { %v4533_v24 = vpop.f32.mrf.mxu0  ;;  %4832 = vmatmul.mubr.f32.gmra.mxu0 %v7049_v25  ;;  %v1432_v59 = vpop.f32.mrf.mxu1 }
 0x138   : > { %v5985_v34 = vadd.f32 %v1400_v37, %v1100_v47  ;;  %v1121_v58 = vadd.f32 %v4533_v24, %v5828_v60  ;;  %4834 = vmatprep.mubr.f32.mxu0 %v7050_v38  ;;  %v7060_v38 = vld [vmem:[#allocation80_spill] sm:$0xff] }
 0x139   : > { %v1113_v26 = vpop.f32.mrf.mxu0  ;;  %v4589_v17 = vpop.f32.mrf.mxu1  ;;  %4888 = vmatmul.mubr.f32.gmra.mxu1 %v7051_v49  ;;  %v7061_v49 = vld [vmem:[#allocation60_spill] sm:$0xff] }
 0x13a   : > { %v5990_v44 = vadd.f32 %v4583_v61, %v1121_v58  ;;  %v1114_v51 = vadd.f32 %v1113_v26, %v5833_v7  ;;  %4890 = vmatprep.mubr.f32.mxu1 %v7052_v11  ;;  %v7059_v58 = vld [vmem:[#allocation76_spill] sm:$0xff]  ;;  %v7062_v11 = vld [vmem:[#allocation67_spill] sm:$0xff] }
 0x13b   : > { %v4536_v46 = vpop.f32.mrf.mxu0  ;;  %4835 = vmatmul.mubr.f32.gmra.mxu0 %v7053_v22  ;;  %v1448_v20 = vpop.f32.mrf.mxu1 }
 0x13c   : > { %v5995_v37 = vadd.f32 %v1416_v21, %v1114_v51  ;;  %v1135_v60 = vadd.f32 %v4536_v46, %v5838_v14  ;;  %4837 = vmatprep.mubr.f32.mxu0 %v7054_v48  ;;  %v7064_v48 = vld [vmem:[#allocation87_spill] sm:$0xff] }
 0x13d   : > { %v1127_v36 = vpop.f32.mrf.mxu0  ;;  %v4592_v28 = vpop.f32.mrf.mxu1  ;;  %4891 = vmatmul.mubr.f32.gmra.mxu1 %v7055_v13  ;;  %v7065_v13 = vld [vmem:[#allocation70_spill] sm:$0xff] }
 0x13e   : > { %v6000_v61 = vadd.f32 %v4586_v52, %v1135_v60  ;;  %v1128_v7 = vadd.f32 %v1127_v36, %v5843_v4  ;;  %4893 = vmatprep.mubr.f32.mxu1 %v7056_v29  ;;  %v7063_v60 = vld [vmem:[#allocation84_spill] sm:$0xff] }
 0x13f   : > { %v4539_v33 = vpop.f32.mrf.mxu0  ;;  %4838 = vmatmul.mubr.f32.gmra.mxu0 %v7057_v55  ;;  %v1464_v47 = vpop.f32.mrf.mxu1  ;;  %v7066_v29 = vld [vmem:[#allocation72_spill] sm:$0xff] }
 0x140   : > { %v6005_v21 = vadd.f32 %v1432_v59, %v1128_v7  ;;  %v1149_v14 = vadd.f32 %v4539_v33, %v5848_v19  ;;  %4840 = vmatprep.mubr.f32.mxu0 %v7058_v9  ;;  %v7068_v9 = vld [vmem:[#allocation96_spill] sm:$0xff] }
 0x141   : > { %v1141_v24 = vpop.f32.mrf.mxu0  ;;  %v4595_v25 = vpop.f32.mrf.mxu1  ;;  %4894 = vmatmul.mubr.f32.gmra.mxu1 %v7059_v58  ;;  %v7069_v58 = vld [vmem:[#allocation77_spill] sm:$0xff] }
 0x142   : > { %v6010_v52 = vadd.f32 %v4589_v17, %v1149_v14  ;;  %v1142_v4 = vadd.f32 %v1141_v24, %v5853_v23  ;;  %4896 = vmatprep.mubr.f32.mxu1 %v7060_v38  ;;  %v7067_v14 = vld [vmem:[#allocation93_spill] sm:$0xff] }
 0x143   : > { %v4542_v26 = vpop.f32.mrf.mxu0  ;;  %4841 = vmatmul.mubr.f32.gmra.mxu0 %v7061_v49  ;;  %v1480_v51 = vpop.f32.mrf.mxu1  ;;  %v7070_v38 = vld [vmem:[#allocation81_spill] sm:$0xff] }
 0x144   : > { %v6015_v59 = vadd.f32 %v1448_v20, %v1142_v4  ;;  %v1163_v19 = vadd.f32 %v4542_v26, %v5858_v62  ;;  %4843 = vmatprep.mubr.f32.mxu0 %v7062_v11  ;;  %v7072_v11 = vld [vmem:[#allocation102_spill] sm:$0xff] }
 0x145   : > { %v1155_v46 = vpop.f32.mrf.mxu0  ;;  %v4598_v22 = vpop.f32.mrf.mxu1  ;;  %4897 = vmatmul.mubr.f32.gmra.mxu1 %v7063_v60  ;;  %v7073_v60 = vld [vmem:[#allocation85_spill] sm:$0xff] }
 0x146   : > { %v6020_v17 = vadd.f32 %v4592_v28, %v1163_v19  ;;  %v1156_v23 = vadd.f32 %v1155_v46, %v5863_v18  ;;  %4899 = vmatprep.mubr.f32.mxu1 %v7064_v48  ;;  %v7071_v19 = vld [vmem:[#allocation99_spill] sm:$0xff]  ;;  %v7074_v48 = vld [vmem:[#allocation90_spill] sm:$0xff] }
 0x147   : > { %v4545_v36 = vpop.f32.mrf.mxu0  ;;  %4844 = vmatmul.mubr.f32.gmra.mxu0 %v7065_v13  ;;  %v1496_v7 = vpop.f32.mrf.mxu1 }
 0x148   : > { %v6025_v20 = vadd.f32 %v1464_v47, %v1156_v23  ;;  %v1177_v62 = vadd.f32 %v4545_v36, %v5868_v40  ;;  %4846 = vmatprep.mubr.f32.mxu0 %v7066_v29  ;;  %v7076_v29 = vld [vmem:[#allocation108_spill] sm:$0xff] }
 0x149   : > { %v1169_v33 = vpop.f32.mrf.mxu0  ;;  %v4601_v55 = vpop.f32.mrf.mxu1  ;;  %4900 = vmatmul.mubr.f32.gmra.mxu1 %v7067_v14  ;;  %v7077_v14 = vld [vmem:[#allocation95_spill] sm:$0xff] }
 0x14a   : > { %v6030_v28 = vadd.f32 %v4595_v25, %v1177_v62  ;;  %v1170_v18 = vadd.f32 %v1169_v33, %v5873_v57  ;;  %4902 = vmatprep.mubr.f32.mxu1 %v7068_v9  ;;  %v7075_v62 = vld [vmem:[#allocation105_spill] sm:$0xff] }
 0x14b   : > { %v4548_v24 = vpop.f32.mrf.mxu0  ;;  %4847 = vmatmul.mubr.f32.gmra.mxu0 %v7069_v58  ;;  %v1512_v4 = vpop.f32.mrf.mxu1  ;;  %v7078_v9 = vld [vmem:[#allocation97_spill] sm:$0xff] }
 0x14c   : > { %v6035_v47 = vadd.f32 %v1480_v51, %v1170_v18  ;;  %v1191_v40 = vadd.f32 %v4548_v24, %v5878_v8  ;;  %4849 = vmatprep.mubr.f32.mxu0 %v7070_v38  ;;  %v7080_v38 = vld [vmem:[#allocation2_spill] sm:$0xff] }
 0x14d   : > { %v1183_v26 = vpop.f32.mrf.mxu0  ;;  %v4604_v49 = vpop.f32.mrf.mxu1  ;;  %4903 = vmatmul.mubr.f32.gmra.mxu1 %v7071_v19  ;;  %v7081_v19 = vld [vmem:[#allocation100_spill] sm:$0xff] }
 0x14e   : > { %v6040_v25 = vadd.f32 %v4598_v22, %v1191_v40  ;;  %v1184_v57 = vadd.f32 %v1183_v26, %v5883_v39  ;;  %4905 = vmatprep.mubr.f32.mxu1 %v7072_v11  ;;  %v7079_v40 = vld [vmem:[#allocation109_spill] sm:$0xff]  ;;  %v7082_v11 = vld [vmem:[#allocation103_spill] sm:$0xff] }
 0x14f   : > { %v4551_v46 = vpop.f32.mrf.mxu0  ;;  %4850 = vmatmul.mubr.f32.gmra.mxu0 %v7073_v60  ;;  %v1528_v23 = vpop.f32.mrf.mxu1 }
 0x150   : > { %v6045_v51 = vadd.f32 %v1496_v7, %v1184_v57  ;;  %v1205_v8 = vadd.f32 %v4551_v46, %v5888_v41  ;;  %4852 = vmatprep.mubr.f32.mxu0 %v7074_v48  ;;  %v7084_v48 = vld [vmem:[#allocation4_spill] sm:$0xff] }
 0x151   : > { %v1197_v36 = vpop.f32.mrf.mxu0  ;;  %v4607_v13 = vpop.f32.mrf.mxu1  ;;  %4906 = vmatmul.mubr.f32.gmra.mxu1 %v7075_v62  ;;  %v7085_v62 = vld [vmem:[#allocation106_spill] sm:$0xff] }
 0x152   : > { %v6050_v22 = vadd.f32 %v4601_v55, %v1205_v8  ;;  %v1198_v39 = vadd.f32 %v1197_v36, %v5893_v1  ;;  %4908 = vmatprep.mubr.f32.mxu1 %v7076_v29  ;;  %v7083_v8 = vld [vmem:[#allocation3_spill] sm:$0xff] }
 0x153   : > { %v4554_v33 = vpop.f32.mrf.mxu0  ;;  %4853 = vmatmul.mubr.f32.gmra.mxu0 %v7077_v14  ;;  %v1544_v18 = vpop.f32.mrf.mxu1  ;;  %v7086_v14 = vld [vmem:[#allocation5_spill] sm:$0xff] }
 0x154   : > { %v6055_v7 = vadd.f32 %v1512_v4, %v1198_v39  ;;  %v1219_v41 = vadd.f32 %v4554_v33, %v5898_v0  ;;  %4855 = vmatprep.mubr.f32.mxu0 %v7078_v9 }
 0x155   : > { %v1211_v24 = vpop.f32.mrf.mxu0  ;;  %v4610_v58 = vpop.f32.mrf.mxu1  ;;  %4909 = vmatmul.mubr.f32.gmra.mxu1 %v7079_v40 }
 0x156   : > { %v6060_v55 = vadd.f32 %v4604_v49, %v1219_v41  ;;  %v1212_v1 = vadd.f32 %v1211_v24, %v5903_v56  ;;  %4963 = vmatprep.mubr.f32.mxu1 %v7080_v38  ;;  %v7087_v41 = vld [vmem:[#allocation6_spill] sm:$0xff] }
 0x157   : > { %v4557_v26 = vpop.f32.mrf.mxu0  ;;  %4856 = vmatmul.mubr.f32.gmra.mxu0 %v7081_v19  ;;  %v1560_v57 = vpop.f32.mrf.mxu1 }
 0x158   : > { %v6065_v4 = vadd.f32 %v1528_v23, %v1212_v1  ;;  %v1233_v0 = vadd.f32 %v4557_v26, %v5908_v54  ;;  %4858 = vmatprep.mubr.f32.mxu0 %v7082_v11  ;;  %v7089_v26 = vld [vmem:[#allocation8_spill] sm:$0xff] }
 0x159   : > { %v1225_v46 = vpop.f32.mrf.mxu0  ;;  %v4665_v60 = vpop.f32.mrf.mxu1  ;;  %4964 = vmatmul.mubr.f32.vlgmr.msra.gmra.mxu1 %v7083_v8 }
 0x15a   : > { %v6070_v49 = vadd.f32 %v4607_v13, %v1233_v0  ;;  %v1226_v56 = vadd.f32 %v1225_v46, %v5914_v27  ;;  %4966 = vmatprep.mubr.f32.mxu1 %v7084_v48 }
 0x15b   : > { %v4560_v36 = vpop.f32.mrf.mxu0  ;;  %4859 = vmatmul.mubr.f32.gmra.mxu0 %v7085_v62  ;;  %v1900_v39 = vpop.f32.mrf.mxu1 }
 0x15c   : > { %v6075_v23 = vadd.f32 %v1544_v18, %v1226_v56  ;;  %v1247_v54 = vadd.f32 %v4560_v36, %v5919_v3  ;;  %4913 = vmatprep.mubr.f32.mxu0 %v7080_v38  ;;  %v7088_v38 = vld [vmem:[#allocation7_spill] sm:$0xff]  ;;  %v7091_v56 = vld [vmem:[#allocation21_spill] sm:$0xff] }
 0x15d   : > { %v1239_v29 = vpop.f32.mrf.mxu0  ;;  %v4668_v33 = vpop.f32.mrf.mxu1  ;;  %4967 = vmatmul.mubr.f32.gmra.mxu1 %v7086_v14 }
 0x15e   : > { %v6080_v13 = vadd.f32 %v4610_v58, %v1247_v54  ;;  %v1240_v27 = vadd.f32 %v1239_v29, %v5924_v31  ;;  %4969 = vmatprep.mubr.f32.mxu1 %v7087_v41  ;;  %v7092_v29 = vld [vmem:[#allocation22_spill] sm:$0xff] }
 0x15f   : > { %v4615_v9 = vpop.f32.mrf.mxu0  ;;  %4914 = vmatmul.mubr.f32.vlgmr.msra.gmra.mxu0 %v7083_v8  ;;  %v1912_v24 = vpop.f32.mrf.mxu1  ;;  %v7090_v8 = vld [vmem:[#allocation11_spill] sm:$0xff] }
 0x160   : > { %v6085_v18 = vadd.f32 %v1560_v57, %v1240_v27  ;;  %v1649_v3 = vadd.f32 %v4615_v9, %v5930_v50  ;;  %4916 = vmatprep.mubr.f32.mxu0 %v7084_v48 }
 0x161   : > { %v1642_v40 = vpop.f32.mrf.mxu0  ;;  %v4671_v1 = vpop.f32.mrf.mxu1  ;;  %4970 = vmatmul.mubr.f32.gmra.mxu1 %v7088_v38 }
 0x162   : > { %v6090_v58 = vadd.f32 %v4665_v60, %v1649_v3  ;;  %v1643_v31 = vadd.f32 %v1642_v40, %v5935_v63  ;;  %4972 = vmatprep.mubr.f32.mxu1 %v7089_v26  ;;  %v7094_v40 = vld [vmem:[#allocation24_spill] sm:$0xff] }
 0x163   : > { %v4618_v19 = vpop.f32.mrf.mxu0  ;;  %4917 = vmatmul.mubr.f32.gmra.mxu0 %v7086_v14  ;;  %v1924_v0 = vpop.f32.mrf.mxu1  ;;  %v7093_v14 = vld [vmem:[#allocation23_spill] sm:$0xff] }
 0x164   : > { %v6095_v57 = vadd.f32 %v1900_v39, %v1643_v31  ;;  %v1661_v50 = vadd.f32 %v4618_v19, %v5940_v45  ;;  %4919 = vmatprep.mubr.f32.mxu0 %v7087_v41 }
 0x165   : > { %v1654_v11 = vpop.f32.mrf.mxu0  ;;  %v4674_v46 = vpop.f32.mrf.mxu1  ;;  %4973 = vmatmul.mubr.f32.gmra.mxu1 %v7090_v8 }
 0x166   : > { %v6100_v60 = vadd.f32 %v4668_v33, %v1661_v50  ;;  %v1655_v63 = vadd.f32 %v1654_v11, %v5945_v42  ;;  %4975 = vmatprep.mubr.f32.mxu1 %v7091_v56  ;;  %v7096_v11 = vld [vmem:[#allocation30_spill] sm:$0xff] }
 0x167   : > { %v4621_v48 = vpop.f32.mrf.mxu0  ;;  %4920 = vmatmul.mubr.f32.gmra.mxu0 %v7088_v38  ;;  %v1936_v36 = vpop.f32.mrf.mxu1  ;;  %v7095_v38 = vld [vmem:[#allocation28_spill] sm:$0xff] }
 0x168   : > { %v6105_v62 = vadd.f32 %v1912_v24, %v1655_v63  ;;  %v1673_v45 = vadd.f32 %v4621_v48, %v5950_v5  ;;  %4922 = vmatprep.mubr.f32.mxu0 %v7089_v26 }
 0x169   : > { %v1666_v39 = vpop.f32.mrf.mxu0  ;;  %v4677_v54 = vpop.f32.mrf.mxu1  ;;  %4976 = vmatmul.mubr.f32.gmra.mxu1 %v7092_v29 }
 0x16a   : > { %v6110_v33 = vadd.f32 %v4671_v1, %v1673_v45  ;;  %v1667_v42 = vadd.f32 %v1666_v39, %v5955_v53  ;;  %4978 = vmatprep.mubr.f32.mxu1 %v7093_v14  ;;  %v7099_v39 = vld [vmem:[#allocation38_spill] sm:$0xff] }
 0x16b   : > { %v4624_v27 = vpop.f32.mrf.mxu0  ;;  %4923 = vmatmul.mubr.f32.gmra.mxu0 %v7090_v8  ;;  %v1948_v41 = vpop.f32.mrf.mxu1  ;;  %v7097_v8 = vld [vmem:[#allocation37_spill] sm:$0xff] }
 0x16c   : > { %v6115_v9 = vadd.f32 %v1924_v0, %v1667_v42  ;;  %v1685_v5 = vadd.f32 %v4624_v27, %v5960_v43  ;;  %4925 = vmatprep.mubr.f32.mxu0 %v7091_v56 }
 0x16d   : > { %v1678_v24 = vpop.f32.mrf.mxu0  ;;  %v4680_v3 = vpop.f32.mrf.mxu1  ;;  %4979 = vmatmul.mubr.f32.gmra.mxu1 %v7094_v40 }
 0x16e   : > { %v6120_v1 = vadd.f32 %v4674_v46, %v1685_v5  ;;  %v1679_v53 = vadd.f32 %v1678_v24, %v5965_v2  ;;  %4981 = vmatprep.mubr.f32.mxu1 %v7095_v38  ;;  %v7103_v24 = vld [vmem:[#allocation49_spill] sm:$0xff] }
 0x16f   : > { %v4627_v31 = vpop.f32.mrf.mxu0  ;;  %4926 = vmatmul.mubr.f32.gmra.mxu0 %v7092_v29  ;;  %v1960_v26 = vpop.f32.mrf.mxu1  ;;  %v7101_v29 = vld [vmem:[#allocation47_spill] sm:$0xff] }
 0x170   : > { %v6125_v19 = vadd.f32 %v1936_v36, %v1679_v53  ;;  %v1697_v43 = vadd.f32 %v4627_v31, %v5970_v16  ;;  %4928 = vmatprep.mubr.f32.mxu0 %v7093_v14 }
 0x171   : > { %v1690_v0 = vpop.f32.mrf.mxu0  ;;  %v4683_v50 = vpop.f32.mrf.mxu1  ;;  %4982 = vmatmul.mubr.f32.gmra.mxu1 %v7096_v11 }
 0x172   : > { %v6130_v46 = vadd.f32 %v4677_v54, %v1697_v43  ;;  %v1691_v2 = vadd.f32 %v1690_v0, %v5975_v35  ;;  %4984 = vmatprep.mubr.f32.mxu1 %v7097_v8  ;;  %v7107_v0 = vld [vmem:[#allocation54_spill] sm:$0xff] }
 0x173   : > { %v4630_v63 = vpop.f32.mrf.mxu0  ;;  %4929 = vmatmul.mubr.f32.gmra.mxu0 %v7094_v40  ;;  %v1972_v56 = vpop.f32.mrf.mxu1  ;;  %v7105_v40 = vld [vmem:[#allocation50_spill] sm:$0xff] }
 0x174   : > { %v6135_v48 = vadd.f32 %v1948_v41, %v1691_v2  ;;  %v1709_v16 = vadd.f32 %v4630_v63, %v5980_v32  ;;  %4931 = vmatprep.mubr.f32.mxu0 %v7095_v38 }
 0x175   : > { %v1702_v36 = vpop.f32.mrf.mxu0  ;;  %v4686_v45 = vpop.f32.mrf.mxu1  ;;  %4985 = vmatmul.mubr.f32.gmra.mxu1 %v7099_v39 }
 0x176   : > { %7098 = vst [vmem:[#allocation88_spill] sm:$0xff] %v6135_v48  ;;  %v6140_v54 = vadd.f32 %v4680_v3, %v1709_v16  ;;  %v1703_v35 = vadd.f32 %v1702_v36, %v5985_v34  ;;  %4987 = vmatprep.mubr.f32.mxu1 %v7101_v29  ;;  %v7111_v36 = vld [vmem:[#allocation61_spill] sm:$0xff] }
 0x177   : > { %v4633_v42 = vpop.f32.mrf.mxu0  ;;  %4932 = vmatmul.mubr.f32.gmra.mxu0 %v7096_v11  ;;  %v1984_v14 = vpop.f32.mrf.mxu1  ;;  %v7109_v11 = vld [vmem:[#allocation59_spill] sm:$0xff] }
 0x178   : > { %7100 = vst [vmem:[#allocation91_spill] sm:$0xff] %v6140_v54  ;;  %v6145_v27 = vadd.f32 %v1960_v26, %v1703_v35  ;;  %v1721_v32 = vadd.f32 %v4633_v42, %v5990_v44  ;;  %4934 = vmatprep.mubr.f32.mxu0 %v7097_v8 }
 0x179   : > { %v1714_v41 = vpop.f32.mrf.mxu0  ;;  %v4689_v5 = vpop.f32.mrf.mxu1  ;;  %4988 = vmatmul.mubr.f32.gmra.mxu1 %v7103_v24 }
 0x17a   : > { %7102 = vst [vmem:[#allocation13_spill] sm:$0xff] %v6145_v27  ;;  %v6150_v3 = vadd.f32 %v4683_v50, %v1721_v32  ;;  %v1715_v34 = vadd.f32 %v1714_v41, %v5995_v37  ;;  %4990 = vmatprep.mubr.f32.mxu1 %v7105_v40  ;;  %v7115_v41 = vld [vmem:[#allocation71_spill] sm:$0xff] }
 0x17b   : > { %v4636_v53 = vpop.f32.mrf.mxu0  ;;  %4935 = vmatmul.mubr.f32.gmra.mxu0 %v7099_v39  ;;  %v1996_v38 = vpop.f32.mrf.mxu1  ;;  %v7113_v39 = vld [vmem:[#allocation64_spill] sm:$0xff] }
 0x17c   : > { %7104 = vst [vmem:[#allocation14_spill] sm:$0xff] %v6150_v3  ;;  %v6155_v31 = vadd.f32 %v1972_v56, %v1715_v34  ;;  %v1733_v44 = vadd.f32 %v4636_v53, %v6000_v61  ;;  %4937 = vmatprep.mubr.f32.mxu0 %v7101_v29 }
 0x17d   : > { %v1726_v26 = vpop.f32.mrf.mxu0  ;;  %v4692_v43 = vpop.f32.mrf.mxu1  ;;  %4991 = vmatmul.mubr.f32.gmra.mxu1 %v7107_v0 }
 0x17e   : > { %7106 = vst [vmem:[#allocation15_spill] sm:$0xff] %v6155_v31  ;;  %v6160_v50 = vadd.f32 %v4686_v45, %v1733_v44  ;;  %v1727_v37 = vadd.f32 %v1726_v26, %v6005_v21  ;;  %4993 = vmatprep.mubr.f32.mxu1 %v7109_v11  ;;  %v7119_v26 = vld [vmem:[#allocation78_spill] sm:$0xff] }
 0x17f   : > { %v4639_v2 = vpop.f32.mrf.mxu0  ;;  %4938 = vmatmul.mubr.f32.gmra.mxu0 %v7103_v24  ;;  %v2008_v8 = vpop.f32.mrf.mxu1  ;;  %v7117_v24 = vld [vmem:[#allocation73_spill] sm:$0xff] }
 0x180   : > { %7108 = vst [vmem:[#allocation17_spill] sm:$0xff] %v6160_v50  ;;  %v6165_v63 = vadd.f32 %v1984_v14, %v1727_v37  ;;  %v1745_v61 = vadd.f32 %v4639_v2, %v6010_v52  ;;  %4940 = vmatprep.mubr.f32.mxu0 %v7105_v40 }
 0x181   : > { %v1738_v56 = vpop.f32.mrf.mxu0  ;;  %v4695_v16 = vpop.f32.mrf.mxu1  ;;  %4994 = vmatmul.mubr.f32.gmra.mxu1 %v7111_v36 }
 0x182   : > { %7110 = vst [vmem:[#allocation18_spill] sm:$0xff] %v6165_v63  ;;  %v6170_v45 = vadd.f32 %v4689_v5, %v1745_v61  ;;  %v1739_v21 = vadd.f32 %v1738_v56, %v6015_v59  ;;  %4996 = vmatprep.mubr.f32.mxu1 %v7113_v39 }
 0x183   : > { %v4642_v35 = vpop.f32.mrf.mxu0  ;;  %4941 = vmatmul.mubr.f32.gmra.mxu0 %v7107_v0  ;;  %v2020_v29 = vpop.f32.mrf.mxu1  ;;  %v7121_v0 = vld [vmem:[#allocation83_spill] sm:$0xff] }
 0x184   : > { %7112 = vst [vmem:[#allocation19_spill] sm:$0xff] %v6170_v45  ;;  %v6175_v42 = vadd.f32 %v1996_v38, %v1739_v21  ;;  %v1757_v52 = vadd.f32 %v4642_v35, %v6020_v17  ;;  %4943 = vmatprep.mubr.f32.mxu0 %v7109_v11 }
 0x185   : > { %v1750_v14 = vpop.f32.mrf.mxu0  ;;  %v4698_v32 = vpop.f32.mrf.mxu1  ;;  %4997 = vmatmul.mubr.f32.gmra.mxu1 %v7115_v41 }
 0x186   : > { %7114 = vst [vmem:[#allocation20_spill] sm:$0xff] %v6175_v42  ;;  %v6180_v5 = vadd.f32 %v4692_v43, %v1757_v52  ;;  %v1751_v59 = vadd.f32 %v1750_v14, %v6025_v20  ;;  %4999 = vmatprep.mubr.f32.mxu1 %v7117_v24 }
 0x187   : > { %v4645_v34 = vpop.f32.mrf.mxu0  ;;  %4944 = vmatmul.mubr.f32.gmra.mxu0 %v7111_v36  ;;  %v2032_v40 = vpop.f32.mrf.mxu1 }
 0x188   : > { %7116 = vst [vmem:[#allocation39_spill] sm:$0xff] %v6180_v5  ;;  %v6185_v53 = vadd.f32 %v2008_v8, %v1751_v59  ;;  %v1769_v17 = vadd.f32 %v4645_v34, %v6030_v28  ;;  %4946 = vmatprep.mubr.f32.mxu0 %v7113_v39 }
 0x189   : > { %v1762_v38 = vpop.f32.mrf.mxu0  ;;  %v4701_v44 = vpop.f32.mrf.mxu1  ;;  %5000 = vmatmul.mubr.f32.gmra.mxu1 %v7119_v26 }
 0x18a   : > { %7118 = vst [vmem:[#allocation42_spill] sm:$0xff] %v6185_v53  ;;  %v6190_v43 = vadd.f32 %v4695_v16, %v1769_v17  ;;  %v1763_v20 = vadd.f32 %v1762_v38, %v6035_v47  ;;  %5002 = vmatprep.mubr.f32.mxu1 %v7121_v0 }
 0x18b   : > { %v4648_v37 = vpop.f32.mrf.mxu0  ;;  %4947 = vmatmul.mubr.f32.gmra.mxu0 %v7115_v41  ;;  %v2044_v11 = vpop.f32.mrf.mxu1 }
 0x18c   : > { %7120 = vst [vmem:[#allocation45_spill] sm:$0xff] %v6190_v43  ;;  %v6195_v2 = vadd.f32 %v2020_v29, %v1763_v20  ;;  %v1781_v28 = vadd.f32 %v4648_v37, %v6040_v25  ;;  %4949 = vmatprep.mubr.f32.mxu0 %v7117_v24 }
 0x18d   : > { %v1774_v8 = vpop.f32.mrf.mxu0  ;;  %v4704_v61 = vpop.f32.mrf.mxu1  ;;  %5003 = vmatmul.mubr.f32.gmra.mxu1 %v7002_v10 }
 0x18e   : > { %7122 = vst [vmem:[#allocation48_spill] sm:$0xff] %v6195_v2  ;;  %v6200_v56 = vadd.f32 %v4698_v32, %v1781_v28  ;;  %v1775_v47 = vadd.f32 %v1774_v8, %v6045_v51  ;;  %5005 = vmatprep.mubr.f32.mxu1 %v7003_v6 }
 0x18f   : > { %v4651_v16 = vpop.f32.mrf.mxu0  ;;  %4950 = vmatmul.mubr.f32.gmra.mxu0 %v7119_v26  ;;  %v2056_v36 = vpop.f32.mrf.mxu1 }
 0x190   : > { %7123 = vst [vmem:[#allocation52_spill] sm:$0xff] %v6200_v56  ;;  %v6205_v21 = vadd.f32 %v2032_v40, %v1775_v47  ;;  %v1793_v25 = vadd.f32 %v4651_v16, %v6050_v22  ;;  %4952 = vmatprep.mubr.f32.mxu0 %v7121_v0 }
 0x191   : > { %v1786_v39 = vpop.f32.mrf.mxu0  ;;  %v4707_v35 = vpop.f32.mrf.mxu1  ;;  %5006 = vmatmul.mubr.f32.gmra.mxu1 %v5508_v15 }
 0x192   : > { %7124 = vst [vmem:[#allocation55_spill] sm:$0xff] %v6205_v21  ;;  %v6210_v29 = vadd.f32 %v4701_v44, %v1793_v25  ;;  %v1787_v51 = vadd.f32 %v1786_v39, %v6055_v7  ;;  %5008 = vmatprep.mubr.f32.mxu1 %v5517_v30 }
 0x193   : > { %v4654_v52 = vpop.f32.mrf.mxu0  ;;  %4953 = vmatmul.mubr.f32.gmra.mxu0 %v7002_v10  ;;  %v2068_v14 = vpop.f32.mrf.mxu1 }
 0x194   : > { %7125 = vst [vmem:[#allocation62_spill] sm:$0xff] %v6210_v29  ;;  %v6215_v32 = vadd.f32 %v2044_v11, %v1787_v51  ;;  %v1805_v22 = vadd.f32 %v4654_v52, %v6060_v55  ;;  %4955 = vmatprep.mubr.f32.mxu0 %v7003_v6 }
 0x195   : > { %v1798_v41 = vpop.f32.mrf.mxu0  ;;  %v4710_v59 = vpop.f32.mrf.mxu1  ;;  %5009 = vmatmul.mubr.f32.gmra.mxu1 %v5536_v12 }
 0x196   : > { %7126 = vst [vmem:[#allocation65_spill] sm:$0xff] %v6215_v32  ;;  %v6220_v24 = vadd.f32 %v4704_v61, %v1805_v22  ;;  %v1799_v7 = vadd.f32 %v1798_v41, %v6065_v4 }
 0x197   : > { %v4657_v34 = vpop.f32.mrf.mxu0  ;;  %4956 = vmatmul.mubr.f32.gmra.mxu0 %v5508_v15  ;;  %v2080_v40 = vpop.f32.mrf.mxu1 }
 0x198   : > { %7127 = vst [vmem:[#allocation68_spill] sm:$0xff] %v6220_v24  ;;  %v6224_v10 = vadd.f32 %v2056_v36, %v1799_v7  ;;  %v1817_v17 = vadd.f32 %v4657_v34, %v6070_v49  ;;  %4958 = vmatprep.mubr.f32.mxu0 %v5517_v30  ;;  %v6238_v49 = vld [vmem:[%s6667_s2 + $0x1] ss:$0 sm:$0xff] }
 0x199   : > { %v1810_v55 = vpop.f32.mrf.mxu0  ;;  %v4765_v6 = vpop.f32.mrf.mxu1 }
 0x19a   : > { %7128 = vst [vmem:[#allocation74_spill] sm:$0xff] %v6224_v10  ;;  %v6228_v38 = vadd.f32 %v4707_v35, %v1817_v17  ;;  %v1811_v44 = vadd.f32 %v1810_v55, %v6075_v23 }
 0x19b   : > { %v4660_v26 = vpop.f32.mrf.mxu0  ;;  %4959 = vmatmul.mubr.f32.gmra.mxu0 %v5536_v12  ;;  %v2558_v4 = vpop.f32.mrf.mxu1 }
 0x19c   : > { %7129 = vst [vmem:[#allocation79_spill] sm:$0xff] %v6228_v38  ;;  %v6232_v20 = vadd.f32 %v2068_v14, %v1811_v44  ;;  %v1829_v15 = vadd.f32 %v4660_v26, %v6080_v13 }
 0x19d   : > { %v1822_v0 = vpop.f32.mrf.mxu0  ;;  %v4768_v30 = vpop.f32.mrf.mxu1 }
 0x19e   : > { %7130 = vst [vmem:[#allocation82_spill] sm:$0xff] %v6232_v20  ;;  %v6240_v37 = vadd.f32 %v4710_v59, %v1829_v15  ;;  %v1823_v11 = vadd.f32 %v1822_v0, %v6085_v18 }
 0x19f   : > { %v4715_v23 = vpop.f32.mrf.mxu0  ;;  %v2570_v28 = vpop.f32.mrf.mxu1 }
 0x1a0   : > { %7131 = vst [vmem:[#allocation86_spill] sm:$0xff] %v6240_v37  ;;  %v6243_v8 = vadd.f32 %v2080_v40, %v1823_v11  ;;  %v2183_v12 = vadd.f32 %v4715_v23, %v6238_v49 }
 0x1a1   : > { %v2172_v61 = vpop.f32.mrf.mxu0  ;;  %v4771_v47 = vpop.f32.mrf.mxu1 }
 0x1a2   : > { %7132 = vst [vmem:[#allocation89_spill] sm:$0xff] %v6243_v8  ;;  %v6246_v13 = vadd.f32 %v4765_v6, %v2183_v12  ;;  %v2173_v16 = vadd.f32 %v6238_v49, %v2172_v61 }
 0x1a3   : > { %v4718_v36 = vpop.f32.mrf.mxu0  ;;  %v2582_v25 = vpop.f32.mrf.mxu1 }
 0x1a4   : > { %v6249_v39 = vadd.f32 %v2558_v4, %v2173_v16  ;;  %v2203_v35 = vadd.f32 %v4718_v36, %v6238_v49 }
 0x1a5   : > { %v2192_v51 = vpop.f32.mrf.mxu0  ;;  %v4774_v18 = vpop.f32.mrf.mxu1 }
 0x1a6   : > { %v6252_v52 = vadd.f32 %v4768_v30, %v2203_v35  ;;  %v2193_v14 = vadd.f32 %v6238_v49, %v2192_v51 }
 0x1a7   : > { %v4721_v22 = vpop.f32.mrf.mxu0  ;;  %v2594_v41 = vpop.f32.mrf.mxu1 }
 0x1a8   : > { %v6255_v59 = vadd.f32 %v2570_v28, %v2193_v14  ;;  %v2223_v7 = vadd.f32 %v4721_v22, %v6238_v49 }
 0x1a9   : > { %v2212_v34 = vpop.f32.mrf.mxu0  ;;  %v4777_v40 = vpop.f32.mrf.mxu1 }
 0x1aa   : > { %v6258_v17 = vadd.f32 %v4771_v47, %v2223_v7  ;;  %v2213_v55 = vadd.f32 %v6238_v49, %v2212_v34 }
 0x1ab   : > { %v4724_v6 = vpop.f32.mrf.mxu0  ;;  %v2606_v44 = vpop.f32.mrf.mxu1 }
 0x1ac   : > { %v6261_v26 = vadd.f32 %v2582_v25, %v2213_v55  ;;  %v2243_v4 = vadd.f32 %v4724_v6, %v6238_v49 }
 0x1ad   : > { %v2232_v15 = vpop.f32.mrf.mxu0  ;;  %v4780_v0 = vpop.f32.mrf.mxu1 }
 0x1ae   : > { %v6264_v30 = vadd.f32 %v4774_v18, %v2243_v4  ;;  %v2233_v11 = vadd.f32 %v6238_v49, %v2232_v15 }
 0x1af   : > { %v4727_v23 = vpop.f32.mrf.mxu0  ;;  %v2618_v28 = vpop.f32.mrf.mxu1 }
 0x1b0   : > { %v6267_v12 = vadd.f32 %v2594_v41, %v2233_v11  ;;  %v2263_v61 = vadd.f32 %v4727_v23, %v6238_v49 }
 0x1b1   : > { %v2252_v47 = vpop.f32.mrf.mxu0  ;;  %v4783_v16 = vpop.f32.mrf.mxu1 }
 0x1b2   : > { %v6270_v36 = vadd.f32 %v4777_v40, %v2263_v61  ;;  %v2253_v25 = vadd.f32 %v6238_v49, %v2252_v47 }
 0x1b3   : > { %v4730_v35 = vpop.f32.mrf.mxu0  ;;  %v2630_v51 = vpop.f32.mrf.mxu1 }
 0x1b4   : > { %v6273_v14 = vadd.f32 %v2606_v44, %v2253_v25  ;;  %v2283_v18 = vadd.f32 %v4730_v35, %v6238_v49 }
 0x1b5   : > { %v2272_v22 = vpop.f32.mrf.mxu0  ;;  %v4786_v7 = vpop.f32.mrf.mxu1 }
 0x1b6   : > { %v6276_v34 = vadd.f32 %v4780_v0, %v2283_v18  ;;  %v2273_v41 = vadd.f32 %v6238_v49, %v2272_v22 }
 0x1b7   : > { %v4733_v55 = vpop.f32.mrf.mxu0  ;;  %v2642_v6 = vpop.f32.mrf.mxu1 }
 0x1b8   : > { %v6279_v4 = vadd.f32 %v2618_v28, %v2273_v41  ;;  %v2303_v40 = vadd.f32 %v4733_v55, %v6238_v49 }
 0x1b9   : > { %v2292_v15 = vpop.f32.mrf.mxu0  ;;  %v4789_v11 = vpop.f32.mrf.mxu1 }
 0x1ba   : > { %v6282_v23 = vadd.f32 %v4783_v16, %v2303_v40  ;;  %v2293_v44 = vadd.f32 %v6238_v49, %v2292_v15 }
 0x1bb   : > { %v4736_v61 = vpop.f32.mrf.mxu0  ;;  %v2654_v47 = vpop.f32.mrf.mxu1 }
 0x1bc   : > { %v6285_v25 = vadd.f32 %v2630_v51, %v2293_v44  ;;  %v2323_v0 = vadd.f32 %v4736_v61, %v6238_v49 }
 0x1bd   : > { %v2312_v35 = vpop.f32.mrf.mxu0  ;;  %v4792_v18 = vpop.f32.mrf.mxu1 }
 0x1be   : > { %v6288_v22 = vadd.f32 %v4786_v7, %v2323_v0  ;;  %v2313_v28 = vadd.f32 %v6238_v49, %v2312_v35 }
 0x1bf   : > { %v4739_v41 = vpop.f32.mrf.mxu0  ;;  %v2666_v55 = vpop.f32.mrf.mxu1 }
 0x1c0   : > { %v6291_v8 = vadd.f32 %v2642_v6, %v2313_v28  ;;  %v2343_v16 = vadd.f32 %v4739_v41, %v6238_v49 }
 0x1c1   : > { %v2332_v40 = vpop.f32.mrf.mxu0  ;;  %v4795_v15 = vpop.f32.mrf.mxu1 }
 0x1c2   : > { %7133 = vst [vmem:[#allocation92_spill] sm:$0xff] %v6291_v8  ;;  %v6294_v37 = vadd.f32 %v4789_v11, %v2343_v16  ;;  %v2333_v51 = vadd.f32 %v6238_v49, %v2332_v40 }
 0x1c3   : > { %v4742_v44 = vpop.f32.mrf.mxu0  ;;  %v2678_v61 = vpop.f32.mrf.mxu1 }
 0x1c4   : > { %7134 = vst [vmem:[#allocation94_spill] sm:$0xff] %v6294_v37  ;;  %v6297_v20 = vadd.f32 %v2654_v47, %v2333_v51  ;;  %v2363_v7 = vadd.f32 %v4742_v44, %v6238_v49 }
 0x1c5   : > { %v2352_v0 = vpop.f32.mrf.mxu0  ;;  %v4798_v35 = vpop.f32.mrf.mxu1 }
 0x1c6   : > { %7135 = vst [vmem:[#allocation98_spill] sm:$0xff] %v6297_v20  ;;  %v6300_v38 = vadd.f32 %v4792_v18, %v2363_v7  ;;  %v2353_v6 = vadd.f32 %v6238_v49, %v2352_v0 }
 0x1c7   : > { %v4745_v28 = vpop.f32.mrf.mxu0  ;;  %v2690_v41 = vpop.f32.mrf.mxu1 }
 0x1c8   : > { %7136 = vst [vmem:[#allocation101_spill] sm:$0xff] %v6300_v38  ;;  %v6303_v10 = vadd.f32 %v2666_v55, %v2353_v6  ;;  %v2383_v11 = vadd.f32 %v4745_v28, %v6238_v49 }
 0x1c9   : > { %v2372_v16 = vpop.f32.mrf.mxu0  ;;  %v4801_v40 = vpop.f32.mrf.mxu1 }
 0x1ca   : > { %7137 = vst [vmem:[#allocation104_spill] sm:$0xff] %v6303_v10  ;;  %v6306_v24 = vadd.f32 %v4795_v15, %v2383_v11  ;;  %v2373_v47 = vadd.f32 %v6238_v49, %v2372_v16 }
 0x1cb   : > { %v4748_v51 = vpop.f32.mrf.mxu0  ;;  %v2702_v44 = vpop.f32.mrf.mxu1 }
 0x1cc   : > { %7138 = vst [vmem:[#allocation107_spill] sm:$0xff] %v6306_v24  ;;  %v6309_v32 = vadd.f32 %v2678_v61, %v2373_v47  ;;  %v2403_v18 = vadd.f32 %v4748_v51, %v6238_v49 }
 0x1cd   : > { %v2392_v7 = vpop.f32.mrf.mxu0  ;;  %v4804_v0 = vpop.f32.mrf.mxu1 }
 0x1ce   : > { %7139 = vst [vmem:[#allocation16_spill] sm:$0xff] %v6309_v32  ;;  %v6312_v29 = vadd.f32 %v4798_v35, %v2403_v18  ;;  %v2393_v55 = vadd.f32 %v6238_v49, %v2392_v7 }
 0x1cf   : > { %v4751_v6 = vpop.f32.mrf.mxu0  ;;  %v2714_v28 = vpop.f32.mrf.mxu1 }
 0x1d0   : > { %7140 = vst [vmem:[#allocation31_spill] sm:$0xff] %v6312_v29  ;;  %v6315_v21 = vadd.f32 %v2690_v41, %v2393_v55  ;;  %v2423_v15 = vadd.f32 %v4751_v6, %v6238_v49 }
 0x1d1   : > { %v2412_v11 = vpop.f32.mrf.mxu0  ;;  %v4807_v16 = vpop.f32.mrf.mxu1 }
 0x1d2   : > { %7141 = vst [vmem:[#allocation9_spill] sm:$0xff] %v6315_v21  ;;  %v6318_v56 = vadd.f32 %v4801_v40, %v2423_v15  ;;  %v2413_v61 = vadd.f32 %v6238_v49, %v2412_v11 }
 0x1d3   : > { %v4754_v47 = vpop.f32.mrf.mxu0  ;;  %v2726_v51 = vpop.f32.mrf.mxu1 }
 0x1d4   : > { %7142 = vst [vmem:[#allocation10_spill] sm:$0xff] %v6318_v56  ;;  %v6321_v2 = vadd.f32 %v2702_v44, %v2413_v61  ;;  %v2443_v35 = vadd.f32 %v4754_v47, %v6238_v49 }
 0x1d5   : > { %v2432_v18 = vpop.f32.mrf.mxu0  ;;  %v4810_v7 = vpop.f32.mrf.mxu1 }
 0x1d6   : > { %7143 = vst [vmem:[#allocation32_spill] sm:$0xff] %v6321_v2  ;;  %v6324_v43 = vadd.f32 %v4804_v0, %v2443_v35  ;;  %v2433_v41 = vadd.f32 %v6238_v49, %v2432_v18 }
 0x1d7   : > { %v4757_v55 = vpop.f32.mrf.mxu0  ;;  %v2738_v6 = vpop.f32.mrf.mxu1 }
 0x1d8   : > { %7144 = vst [vmem:[#allocation33_spill] sm:$0xff] %v6324_v43  ;;  %v6327_v53 = vadd.f32 %v2714_v28, %v2433_v41  ;;  %v2463_v40 = vadd.f32 %v4757_v55, %v6238_v49 }
 0x1d9   : > { %v2452_v15 = vpop.f32.mrf.mxu0  ;;  %v6330_v11 = vpop.f32.mrf.mxu1 }
 0x1da   : > { %7145 = vst [vmem:[#allocation12_spill] sm:$0xff] %v6327_v53  ;;  %v6332_v56 = vadd.f32 %v4807_v16, %v2463_v40  ;;  %v2453_v44 = vadd.f32 %v6238_v49, %v2452_v15 }
 0x1db   : > { %v4760_v61 = vpop.f32.mrf.mxu0  ;;  %v6335_v47 = vpop.f32.mrf.mxu1 }
 0x1dc   : > { %7146 = vst [vmem:[#allocation25_spill] sm:$0xff] %v6332_v56  ;;  %v6337_v0 = vadd.f32 %v2726_v51, %v2453_v44  ;;  %v2483_v35 = vadd.f32 %v4760_v61, %v6238_v49 }
 0x1dd   : > { %v2472_v18 = vpop.f32.mrf.mxu0  ;;  %v6340_v43 = vpop.f32.mrf.mxu1 }
 0x1de   : > { %7147 = vst [vmem:[#allocation35_spill] sm:$0xff] %v6337_v0  ;;  %v6342_v28 = vadd.f32 %v4810_v7, %v2483_v35  ;;  %v2473_v41 = vadd.f32 %v6238_v49, %v2472_v18 }
 0x1df   : > { %v4815_v55 = vpop.f32.mrf.mxu0  ;;  %v6345_v53 = vpop.f32.mrf.mxu1 }
 0x1e0   : > { %7148 = vst [vmem:[#allocation40_spill] sm:$0xff] %v6342_v28  ;;  %v6347_v16 = vadd.f32 %v2738_v6, %v2473_v41 }
 0x1e1   : > { %v2818_v40 = vpop.f32.mrf.mxu0  ;;  %v6349_v15 = vpop.f32.mrf.mxu1 }
 0x1e2   : > { %7149 = vst [vmem:[#allocation26_spill] sm:$0xff] %v6347_v16 }
 0x1e3   : > { %v6351_v56 = vpop.f32.mrf.mxu0  ;;  %v6353_v51 = vpop.f32.mrf.mxu1 }
 0x1e5   : > { %v6355_v44 = vpop.f32.mrf.mxu0  ;;  %v6357_v61 = vpop.f32.mrf.mxu1 }
 0x1e7   : > { %v6359_v7 = vpop.f32.mrf.mxu0  ;;  %v6361_v35 = vpop.f32.mrf.mxu1 }
 0x1e9   : > { %v6363_v49 = vpop.f32.mrf.mxu0  ;;  %v6365_v18 = vpop.f32.mrf.mxu1 }
 0x1eb   : > { %v6367_v6 = vpop.f32.mrf.mxu0  ;;  %v6369_v41 = vpop.f32.mrf.mxu1 }
 0x1ed   : > { %v6371_v16 = vpop.f32.mrf.mxu0  ;;  %v6373_v28 = vpop.f32.mrf.mxu1 }
 0x1ef   : > { %v6375_v0 = vpop.f32.mrf.mxu0  ;;  %v6377_v2 = vpop.f32.mrf.mxu1 }
 0x1f1   : > { %v6379_v5 = vpop.f32.mrf.mxu0  ;;  %v6381_v21 = vpop.f32.mrf.mxu1 }
 0x1f3   : > { %v6383_v42 = vpop.f32.mrf.mxu0  ;;  %v6385_v29 = vpop.f32.mrf.mxu1 }
 0x1f4   : > { %7150 = vst [vmem:[#allocation27_spill] sm:$0xff] %v6385_v29 }
 0x1f5   : > { %v6387_v45 = vpop.f32.mrf.mxu0  ;;  %v6389_v32 = vpop.f32.mrf.mxu1 }
 0x1f6   : > { %7151 = vst [vmem:[#allocation43_spill] sm:$0xff] %v6389_v32 }
 0x1f7   : > { %v6391_v63 = vpop.f32.mrf.mxu0  ;;  %v6393_v24 = vpop.f32.mrf.mxu1 }
 0x1f8   : > { %7152 = vst [vmem:[#allocation46_spill] sm:$0xff] %v6393_v24 }
 0x1f9   : > { %v6395_v50 = vpop.f32.mrf.mxu0  ;;  %v6397_v10 = vpop.f32.mrf.mxu1 }
 0x1fa   : > { %7153 = vst [vmem:[#allocation29_spill] sm:$0xff] %v6397_v10 }
 0x1fb   : > { %v6399_v31 = vpop.f32.mrf.mxu0  ;;  %v6401_v38 = vpop.f32.mrf.mxu1 }
 0x1fc   : > { %7154 = vst [vmem:[#allocation34_spill] sm:$0xff] %v6399_v31  ;;  %7155 = vst [vmem:[#allocation53_spill] sm:$0xff] %v6401_v38 }
 0x1fd   : > { %v6403_v3 = vpop.f32.mrf.mxu0  ;;  %v6405_v20 = vpop.f32.mrf.mxu1 }
 0x1fe   : > { %7156 = vst [vmem:[#allocation57_spill] sm:$0xff] %v6403_v3  ;;  %7157 = vst [vmem:[#allocation36_spill] sm:$0xff] %v6405_v20 }
 0x1ff   : > { %v6407_v27 = vpop.f32.mrf.mxu0  ;;  %v6409_v37 = vpop.f32.mrf.mxu1 }
 0x200   : > { %7158 = vst [vmem:[#allocation41_spill] sm:$0xff] %v6407_v27  ;;  %7159 = vst [vmem:[#allocation63_spill] sm:$0xff] %v6409_v37 }
 0x201   : > { %v6411_v32 = vpop.f32.mrf.mxu0  ;;  %v6413_v54 = vpop.f32.mrf.mxu1 }
 0x202   : > { %7160 = vst [vmem:[#allocation66_spill] sm:$0xff] %v6411_v32  ;;  %7161 = vst [vmem:[#allocation44_spill] sm:$0xff] %v6413_v54 }
 0x203   : > { %v6415_v24 = vpop.f32.mrf.mxu0  ;;  %v6417_v8 = vpop.f32.mrf.mxu1 }
 0x204   : > { %7162 = vst [vmem:[#allocation51_spill] sm:$0xff] %v6415_v24  ;;  %7163 = vst [vmem:[#allocation69_spill] sm:$0xff] %v6417_v8 }
 0x205   : > { %v6419_v10 = vpop.f32.mrf.mxu0  ;;  %v6421_v29 = vpop.f32.mrf.mxu1 }
 0x206   : > { %7164 = vst [vmem:[#allocation75_spill] sm:$0xff] %v6419_v10  ;;  %7165 = vst [vmem:[#allocation56_spill] sm:$0xff] %v6421_v29 }
 0x207   : > { %v6423_v38 = vpop.f32.mrf.mxu0  ;;  %v6425_v3 = vpop.f32.mrf.mxu1 }
 0x208   : > { %7166 = vst [vmem:[#allocation58_spill] sm:$0xff] %v6423_v38  ;;  %7167 = vst [vmem:[#allocation76_spill] sm:$0xff] %v6425_v3 }
 0x209   : > { %v6427_v20 = vpop.f32.mrf.mxu0  ;;  %v6429_v27 = vpop.f32.mrf.mxu1 }
 0x20a   : > { %7168 = vst [vmem:[#allocation80_spill] sm:$0xff] %v6427_v20  ;;  %7169 = vst [vmem:[#allocation60_spill] sm:$0xff] %v6429_v27 }
 0x20b   : > { %v6431_v37 = vpop.f32.mrf.mxu0  ;;  %v6433_v32 = vpop.f32.mrf.mxu1 }
 0x20c   : > { %7170 = vst [vmem:[#allocation67_spill] sm:$0xff] %v6431_v37  ;;  %7171 = vst [vmem:[#allocation84_spill] sm:$0xff] %v6433_v32 }
 0x20d   : > { %v6435_v54 = vpop.f32.mrf.mxu0  ;;  %v6437_v24 = vpop.f32.mrf.mxu1 }
 0x20e   : > { %7172 = vst [vmem:[#allocation87_spill] sm:$0xff] %v6435_v54  ;;  %7173 = vst [vmem:[#allocation70_spill] sm:$0xff] %v6437_v24 }
 0x20f   : > { %v6439_v8 = vpop.f32.mrf.mxu0  ;;  %v6441_v10 = vpop.f32.mrf.mxu1 }
 0x210   : > { %7174 = vst [vmem:[#allocation72_spill] sm:$0xff] %v6439_v8  ;;  %7175 = vst [vmem:[#allocation93_spill] sm:$0xff] %v6441_v10  ;;  %v2826_v10 = vadd.f32 %v4815_v55, %v6246_v13  ;;  %v2833_v13 = vadd.f32 %v6355_v44, %v6255_v59 }
 0x211   : > { %v6443_v29 = vpop.f32.mrf.mxu0  ;;  %v6445_v38 = vpop.f32.mrf.mxu1 }
 0x212   : > { %7176 = vst [vmem:[#allocation96_spill] sm:$0xff] %v6443_v29  ;;  %7177 = vst [vmem:[#allocation77_spill] sm:$0xff] %v6445_v38 }
 0x213   : > { %v6447_v3 = vpop.f32.mrf.mxu0  ;;  %v6449_v20 = vpop.f32.mrf.mxu1 }
 0x214   : > { %7178 = vst [vmem:[#allocation81_spill] sm:$0xff] %v6447_v3  ;;  %7179 = vst [vmem:[#allocation99_spill] sm:$0xff] %v6449_v20  ;;  %v2819_v3 = vadd.f32 %v2818_v40, %v6249_v39  ;;  %v2854_v39 = vadd.f32 %v6359_v7, %v6258_v17  ;;  %v2868_v17 = vadd.f32 %v6367_v6, %v6264_v30 }
 0x215   : > { %v6451_v27 = vpop.f32.mrf.mxu0  ;;  %v6453_v37 = vpop.f32.mrf.mxu1 }
 0x216   : > { %7180 = vst [vmem:[#allocation102_spill] sm:$0xff] %v6451_v27  ;;  %7181 = vst [vmem:[#allocation85_spill] sm:$0xff] %v6453_v37  ;;  %v3118_v37 = vadd.f32 %v6330_v11, %v2826_v10  ;;  %v3166_v7 = vadd.f32 %v6357_v61, %v2868_v17 }
 0x217   : > { %v6455_v32 = vpop.f32.mrf.mxu0  ;;  %v6457_v54 = vpop.f32.mrf.mxu1 }
 0x218   : > { %7182 = vst [vmem:[#allocation90_spill] sm:$0xff] %v6455_v32  ;;  %7183 = vst [vmem:[#allocation105_spill] sm:$0xff] %v6457_v54  ;;  %v2840_v32 = vadd.f32 %v6351_v56, %v6252_v52  ;;  %v2847_v56 = vadd.f32 %v6363_v49, %v6261_v26  ;;  %v2875_v49 = vadd.f32 %v6379_v5, %v6273_v14 }
 0x219   : > { %v6459_v24 = vpop.f32.mrf.mxu0  ;;  %v4965_v8 = vpop.f32.mrf.mxu1 }
 0x21a   : > { %7184 = vst [vmem:[#allocation108_spill] sm:$0xff] %v6459_v24  ;;  %v3110_v24 = vadd.f32 %v6335_v47, %v2819_v3 }
 0x21b   : > { %v6462_v29 = vpop.f32.mrf.mxu0  ;;  %v3689_v38 = vpop.f32.mrf.mxu1 }
 0x21c   : > { %7185 = vst [vmem:[#allocation95_spill] sm:$0xff] %v6462_v29  ;;  %v3134_v29 = vadd.f32 %v6340_v43, %v2840_v32 }
 0x21d   : > { %v6465_v48 = vpop.f32.mrf.mxu0  ;;  %v4968_v20 = vpop.f32.mrf.mxu1 }
 0x21e   : > { %7186 = vst [vmem:[#allocation97_spill] sm:$0xff] %v6465_v48 }
 0x21f   : > { %v4915_v54 = vpop.f32.mrf.mxu0  ;;  %v3701_v27 = vpop.f32.mrf.mxu1 }
 0x220   : > { %v3438_v55 = vadd.f32 %v4915_v54, %v3118_v37  ;;  %v3126_v37 = vadd.f32 %v6345_v53, %v2833_v13  ;;  %v3142_v53 = vadd.f32 %v6353_v51, %v2847_v56  ;;  %v2910_v56 = vadd.f32 %v6391_v63, %v6282_v23 }
 0x221   : > { %v3431_v40 = vpop.f32.mrf.mxu0  ;;  %v4971_v48 = vpop.f32.mrf.mxu1 }
 0x222   : > { %v3696_v31 = vadd.f32 %v4965_v8, %v3438_v55  ;;  %v3432_v10 = vadd.f32 %v3431_v40, %v3110_v24  ;;  %v3150_v8 = vadd.f32 %v6349_v15, %v2854_v39  ;;  %v2882_v15 = vadd.f32 %v6375_v0, %v6270_v36 }
 0x223   : > { %v4918_v54 = vpop.f32.mrf.mxu0  ;;  %v3713_v3 = vpop.f32.mrf.mxu1  ;;  %v3174_v39 = vadd.f32 %v6369_v41, %v2875_v49 }
 0x224   : > { %v3880_v43 = vmul.f32 %v3696_v31, %v6090_v58  ;;  %v3690_v32 = vadd.f32 %v3689_v38, %v3432_v10  ;;  %v3450_v24 = vadd.f32 %v4918_v54, %v3134_v29  ;;  %v2861_v31 = vadd.f32 %v6371_v16, %v6267_v12 }
 0x225   : > { %v3443_v52 = vpop.f32.mrf.mxu0  ;;  %v4974_v59 = vpop.f32.mrf.mxu1  ;;  %v3182_v13 = vadd.f32 %v6365_v18, %v2882_v15  ;;  %v2889_v10 = vadd.f32 %v6387_v45, %v6279_v4 }
 0x226   : > { %3913 = vst.msk [vmem:[%s6483_s29 + $0x8] sm:$0xff] %vm3911_vm1, %v3880_v43  ;;  %v3879_v26 = vmul.f32 %v3690_v32, %v6095_v57  ;;  %v3708_v11 = vadd.f32 %v4968_v20, %v3450_v24  ;;  %v3444_v47 = vadd.f32 %v3443_v52, %v3126_v37  ;;  %v3158_v6 = vadd.f32 %v6361_v35, %v2861_v31  ;;  %v7187_v52 = vld [vmem:[#allocation34_spill] sm:$0xff] }
 0x227   : > { %v4921_v44 = vpop.f32.mrf.mxu0  ;;  %v3725_v58 = vpop.f32.mrf.mxu1  ;;  %v2903_v37 = vadd.f32 %v6395_v50, %v6285_v25  ;;  %v3190_v32 = vadd.f32 %v6377_v2, %v2889_v10  ;;  %v3214_v24 = vadd.f32 %v6381_v21, %v2910_v56  ;;  %v7188_v50 = vld [vmem:[#allocation88_spill] sm:$0xff]  ;;  %v7192_v21 = vld [vmem:[#allocation91_spill] sm:$0xff]  ;;  %v7202_v10 = vld [vmem:[#allocation101_spill] sm:$0xff] }
 0x228   : > { %3912 = vst.msk [vmem:[%s6483_s29] sm:$0xff] %vm3911_vm1, %v3879_v26  ;;  %v3882_v29 = vmul.f32 %v3708_v11, %v6100_v60  ;;  %v3702_v38 = vadd.f32 %v3701_v27, %v3444_v47  ;;  %v3462_v30 = vadd.f32 %v4921_v44, %v3150_v8  ;;  %v7189_v26 = vld [vmem:[#allocation27_spill] sm:$0xff]  ;;  %v7191_v44 = vld [vmem:[#allocation57_spill] sm:$0xff] }
 0x229   : > { %v3455_v57 = vpop.f32.mrf.mxu0  ;;  %v4977_v20 = vpop.f32.mrf.mxu1  ;;  %v3206_v11 = vadd.f32 %v7189_v26, %v2903_v37  ;;  %v7206_v37 = vld [vmem:[#allocation104_spill] sm:$0xff] }
 0x22a   : > { %3915 = vst.msk [vmem:[%s6483_s29 + $0x18] sm:$0xff] %vm3911_vm1, %v3882_v29  ;;  %v3881_v51 = vmul.f32 %v3702_v38, %v6105_v62  ;;  %v3720_v12 = vadd.f32 %v4971_v48, %v3462_v30  ;;  %v3456_v16 = vadd.f32 %v3455_v57, %v3142_v53  ;;  %v2896_v48 = vadd.f32 %v6383_v42, %v6276_v34  ;;  %v7190_v53 = vld [vmem:[#allocation92_spill] sm:$0xff]  ;;  %v7193_v38 = vld [vmem:[#allocation94_spill] sm:$0xff]  ;;  %v7194_v30 = vld [vmem:[#allocation41_spill] sm:$0xff] }
 0x22b   : > { %v4924_v60 = vpop.f32.mrf.mxu0  ;;  %v3737_v27 = vpop.f32.mrf.mxu1  ;;  %v2938_v15 = vadd.f32 %v7194_v30, %v7193_v38 }
 0x22c   : > { %3914 = vst.msk [vmem:[%s6483_s29 + $0x10] sm:$0xff] %vm3911_vm1, %v3881_v51  ;;  %v3884_v36 = vmul.f32 %v3720_v12, %v6110_v33  ;;  %v3714_v0 = vadd.f32 %v3713_v3, %v3456_v16  ;;  %v3474_v61 = vadd.f32 %v4924_v60, %v3166_v7  ;;  %v3198_v3 = vadd.f32 %v6373_v28, %v2896_v48  ;;  %v7195_v7 = vld [vmem:[#allocation43_spill] sm:$0xff]  ;;  %v7196_v12 = vld [vmem:[#allocation13_spill] sm:$0xff] }
 0x22d   : > { %v3467_v55 = vpop.f32.mrf.mxu0  ;;  %v4980_v62 = vpop.f32.mrf.mxu1 }
 0x22e   : > { %3917 = vst.msk [vmem:[%s6483_s29 + $0x28] sm:$0xff] %vm3911_vm1, %v3884_v36  ;;  %v3883_v5 = vmul.f32 %v3714_v0, %v6115_v9  ;;  %v3732_v14 = vadd.f32 %v4974_v59, %v3474_v61  ;;  %v3468_v35 = vadd.f32 %v3467_v55, %v3158_v6  ;;  %v2924_v59 = vadd.f32 %v7187_v52, %v6288_v22  ;;  %v7198_v6 = vld [vmem:[#allocation66_spill] sm:$0xff] }
 0x22f   : > { %v4927_v40 = vpop.f32.mrf.mxu0  ;;  %v3749_v33 = vpop.f32.mrf.mxu1 }
 0x230   : > { %3916 = vst.msk [vmem:[%s6483_s29 + $0x20] sm:$0xff] %vm3911_vm1, %v3883_v5  ;;  %v3886_v18 = vmul.f32 %v3732_v14, %v6120_v1  ;;  %v3726_v42 = vadd.f32 %v3725_v58, %v3468_v35  ;;  %v3486_v34 = vadd.f32 %v4927_v40, %v3182_v13  ;;  %v2917_v58 = vadd.f32 %v7191_v44, %v7190_v53  ;;  %v7199_v13 = vld [vmem:[#allocation46_spill] sm:$0xff]  ;;  %v7201_v35 = vld [vmem:[#allocation29_spill] sm:$0xff]  ;;  %v7214_v53 = vld [vmem:[#allocation80_spill] sm:$0xff] }
 0x231   : > { %v3479_v9 = vpop.f32.mrf.mxu0  ;;  %v4983_v54 = vpop.f32.mrf.mxu1  ;;  %v3230_v51 = vadd.f32 %v7195_v7, %v2924_v59 }
 0x232   : > { %3919 = vst.msk [vmem:[%s6483_s29 + $0x38] sm:$0xff] %vm3911_vm1, %v3886_v18  ;;  %v3885_v41 = vmul.f32 %v3726_v42, %v6125_v19  ;;  %v3744_v45 = vadd.f32 %v4977_v20, %v3486_v34  ;;  %v3480_v4 = vadd.f32 %v3479_v9, %v3174_v39  ;;  %v3222_v55 = vadd.f32 %v7199_v13, %v2917_v58  ;;  %v7203_v18 = vld [vmem:[#allocation51_spill] sm:$0xff] }
 0x233   : > { %v4930_v1 = vpop.f32.mrf.mxu0  ;;  %v3761_v43 = vpop.f32.mrf.mxu1  ;;  %v3246_v39 = vadd.f32 %v7201_v35, %v2938_v15  ;;  %v2952_v42 = vadd.f32 %v7203_v18, %v7202_v10  ;;  %v7204_v34 = vld [vmem:[#allocation15_spill] sm:$0xff]  ;;  %v7217_v15 = vld [vmem:[#allocation44_spill] sm:$0xff] }
 0x234   : > { %3918 = vst.msk [vmem:[%s6483_s29 + $0x30] sm:$0xff] %vm3911_vm1, %v3885_v41  ;;  %v3888_v63 = vmul.f32 %v3744_v45, %v6130_v46  ;;  %v3738_v23 = vadd.f32 %v3737_v27, %v3480_v4  ;;  %v3498_v28 = vadd.f32 %v4930_v1, %v3198_v3  ;;  %v7197_v27 = vld [vmem:[#allocation98_spill] sm:$0xff]  ;;  %v7205_v3 = vld [vmem:[#allocation53_spill] sm:$0xff]  ;;  %v7207_v1 = vld [vmem:[#allocation75_spill] sm:$0xff] }
 0x235   : > { %v3491_v8 = vpop.f32.mrf.mxu0  ;;  %v4986_v19 = vpop.f32.mrf.mxu1  ;;  %v2931_v36 = vadd.f32 %v7198_v6, %v7197_v27  ;;  %v7226_v10 = vld [vmem:[#allocation72_spill] sm:$0xff] }
 0x236   : > { %3921 = vst.msk [vmem:[%s6483_s29 + $0x48] sm:$0xff] %vm3911_vm1, %v3888_v63  ;;  %v3887_v25 = vmul.f32 %v3738_v23, %v7188_v50  ;;  %v3756_v2 = vadd.f32 %v4980_v62, %v3498_v28  ;;  %v3492_v17 = vadd.f32 %v3491_v8, %v3190_v32  ;;  %v7200_v62 = vld [vmem:[#allocation14_spill] sm:$0xff]  ;;  %v7208_v32 = vld [vmem:[#allocation17_spill] sm:$0xff]  ;;  %v7211_v50 = vld [vmem:[#allocation36_spill] sm:$0xff] }
 0x237   : > { %v4933_v47 = vpop.f32.mrf.mxu0  ;;  %v3773_v46 = vpop.f32.mrf.mxu1  ;;  %v3238_v41 = vadd.f32 %v7205_v3, %v2931_v36  ;;  %v7210_v8 = vld [vmem:[#allocation58_spill] sm:$0xff]  ;;  %v7221_v36 = vld [vmem:[#allocation69_spill] sm:$0xff] }
 0x238   : > { %3920 = vst.msk [vmem:[%s6483_s29 + $0x40] sm:$0xff] %vm3911_vm1, %v3887_v25  ;;  %v3890_v31 = vmul.f32 %v3756_v2, %v7192_v21  ;;  %v3750_v22 = vadd.f32 %v3749_v33, %v3492_v17  ;;  %v3510_v29 = vadd.f32 %v4933_v47, %v3214_v24  ;;  %v7209_v24 = vld [vmem:[#allocation107_spill] sm:$0xff]  ;;  %v3262_v25 = vadd.f32 %v7211_v50, %v2952_v42  ;;  %v7212_v2 = vld [vmem:[#allocation18_spill] sm:$0xff]  ;;  %v7213_v47 = vld [vmem:[#allocation16_spill] sm:$0xff] }
 0x239   : > { %v3503_v57 = vpop.f32.mrf.mxu0  ;;  %v4989_v20 = vpop.f32.mrf.mxu1  ;;  %v2966_v52 = vadd.f32 %v7210_v8, %v7209_v24  ;;  %v2959_v44 = vadd.f32 %v7214_v53, %v7213_v47  ;;  %v7215_v21 = vld [vmem:[#allocation63_spill] sm:$0xff] }
 0x23a   : > { %3923 = vst.msk [vmem:[%s6483_s29 + $0x58] sm:$0xff] %vm3911_vm1, %v3890_v31  ;;  %v3889_v16 = vmul.f32 %v3750_v22, %v7196_v12  ;;  %v3768_v49 = vadd.f32 %v4983_v54, %v3510_v29  ;;  %v3504_v60 = vadd.f32 %v3503_v57, %v3206_v11  ;;  %v7216_v22 = vld [vmem:[#allocation19_spill] sm:$0xff] }
 0x23b   : > { %v4936_v0 = vpop.f32.mrf.mxu0  ;;  %v3785_v61 = vpop.f32.mrf.mxu1  ;;  %v3278_v57 = vadd.f32 %v7217_v15, %v2966_v52  ;;  %v7219_v12 = vld [vmem:[#allocation67_spill] sm:$0xff]  ;;  %v7233_v52 = vld [vmem:[#allocation60_spill] sm:$0xff] }
 0x23c   : > { %3922 = vst.msk [vmem:[%s6483_s29 + $0x50] sm:$0xff] %vm3911_vm1, %v3889_v16  ;;  %v3892_v48 = vmul.f32 %v3768_v49, %v7200_v62  ;;  %v3762_v5 = vadd.f32 %v3761_v43, %v3504_v60  ;;  %v3522_v14 = vadd.f32 %v4936_v0, %v3230_v51  ;;  %v2945_v43 = vadd.f32 %v7207_v1, %v7206_v37  ;;  %v7220_v49 = vld [vmem:[#allocation20_spill] sm:$0xff]  ;;  %v7223_v62 = vld [vmem:[#allocation87_spill] sm:$0xff] }
 0x23d   : > { %v3515_v40 = vpop.f32.mrf.mxu0  ;;  %v4992_v33 = vpop.f32.mrf.mxu1  ;;  %v3270_v0 = vadd.f32 %v7221_v36, %v2959_v44  ;;  %v7230_v37 = vld [vmem:[#allocation96_spill] sm:$0xff] }
 0x23e   : > { %3925 = vst.msk [vmem:[%s6483_s29 + $0x68] sm:$0xff] %vm3911_vm1, %v3892_v48  ;;  %v3891_v56 = vmul.f32 %v3762_v5, %v7204_v34  ;;  %v3780_v9 = vadd.f32 %v4986_v19, %v3522_v14  ;;  %v3516_v54 = vadd.f32 %v3515_v40, %v3222_v55  ;;  %v3254_v31 = vadd.f32 %v7215_v21, %v2945_v43  ;;  %v7224_v5 = vld [vmem:[#allocation39_spill] sm:$0xff]  ;;  %v7225_v40 = vld [vmem:[#allocation10_spill] sm:$0xff]  ;;  %v7227_v34 = vld [vmem:[#allocation56_spill] sm:$0xff] }
 0x23f   : > { %v4939_v45 = vpop.f32.mrf.mxu0  ;;  %v3797_v4 = vpop.f32.mrf.mxu1  ;;  %v2994_v18 = vadd.f32 %v7226_v10, %v7225_v40  ;;  %v7237_v44 = vld [vmem:[#allocation84_spill] sm:$0xff]  ;;  %v7249_v10 = vld [vmem:[#allocation77_spill] sm:$0xff] }
 0x240   : > { %3924 = vst.msk [vmem:[%s6483_s29 + $0x60] sm:$0xff] %vm3911_vm1, %v3891_v56  ;;  %v3894_v63 = vmul.f32 %v3780_v9, %v7208_v32  ;;  %v3774_v23 = vadd.f32 %v3773_v46, %v3516_v54  ;;  %v3534_v28 = vadd.f32 %v4939_v45, %v3246_v39  ;;  %v7228_v9 = vld [vmem:[#allocation42_spill] sm:$0xff]  ;;  %v7229_v45 = vld [vmem:[#allocation32_spill] sm:$0xff] }
 0x241   : > { %v3527_v59 = vpop.f32.mrf.mxu0  ;;  %v4995_v19 = vpop.f32.mrf.mxu1  ;;  %v2987_v1 = vadd.f32 %v7230_v37, %v7229_v45  ;;  %v7231_v32 = vld [vmem:[#allocation76_spill] sm:$0xff]  ;;  %v7253_v45 = vld [vmem:[#allocation99_spill] sm:$0xff] }
 0x242   : > { %3927 = vst.msk [vmem:[%s6483_s29 + $0x78] sm:$0xff] %vm3911_vm1, %v3894_v63  ;;  %v3893_v17 = vmul.f32 %v3774_v23, %v7212_v2  ;;  %v3792_v26 = vadd.f32 %v4989_v20, %v3534_v28  ;;  %v3528_v11 = vadd.f32 %v3527_v59, %v3238_v41  ;;  %v7218_v20 = vld [vmem:[#allocation31_spill] sm:$0xff]  ;;  %v7232_v23 = vld [vmem:[#allocation45_spill] sm:$0xff]  ;;  %v3310_v59 = vadd.f32 %v7233_v52, %v2994_v18 }
 0x243   : > { %v4942_v58 = vpop.f32.mrf.mxu0  ;;  %v3809_v46 = vpop.f32.mrf.mxu1  ;;  %v2980_v16 = vadd.f32 %v7219_v12, %v7218_v20  ;;  %v7235_v2 = vld [vmem:[#allocation81_spill] sm:$0xff]  ;;  %v7242_v20 = vld [vmem:[#allocation90_spill] sm:$0xff] }
 0x244   : > { %3926 = vst.msk [vmem:[%s6483_s29 + $0x70] sm:$0xff] %vm3911_vm1, %v3893_v17  ;;  %v3896_v29 = vmul.f32 %v3792_v26, %v7216_v22  ;;  %v3786_v38 = vadd.f32 %v3785_v61, %v3528_v11  ;;  %v3546_v30 = vadd.f32 %v4942_v58, %v3262_v25  ;;  %v7222_v61 = vld [vmem:[#allocation9_spill] sm:$0xff]  ;;  %v7236_v26 = vld [vmem:[#allocation48_spill] sm:$0xff]  ;;  %v3302_v58 = vadd.f32 %v7237_v44, %v2987_v1  ;;  %v7239_v22 = vld [vmem:[#allocation102_spill] sm:$0xff] }
 0x245   : > { %v3539_v7 = vpop.f32.mrf.mxu0  ;;  %v4998_v51 = vpop.f32.mrf.mxu1  ;;  %v2973_v48 = vadd.f32 %v7223_v62, %v7222_v61  ;;  %v3294_v56 = vadd.f32 %v7227_v34, %v2980_v16  ;;  %v7250_v34 = vld [vmem:[#allocation40_spill] sm:$0xff]  ;;  %v7260_v44 = vld [vmem:[#allocation79_spill] sm:$0xff] }
 0x246   : > { %3929 = vst.msk [vmem:[%s6483_s29 + $0x88] sm:$0xff] %vm3911_vm1, %v3896_v29  ;;  %v3895_v60 = vmul.f32 %v3786_v38, %v7220_v49  ;;  %v3804_v27 = vadd.f32 %v4992_v33, %v3546_v30  ;;  %v3540_v6 = vadd.f32 %v3539_v7, %v3254_v31  ;;  %v7240_v38 = vld [vmem:[#allocation52_spill] sm:$0xff]  ;;  %v7241_v7 = vld [vmem:[#allocation25_spill] sm:$0xff] }
 0x247   : > { %v4945_v13 = vpop.f32.mrf.mxu0  ;;  %v3821_v55 = vpop.f32.mrf.mxu1  ;;  %v3286_v63 = vadd.f32 %v7231_v32, %v2973_v48  ;;  %v3022_v12 = vadd.f32 %v7242_v20, %v7241_v7  ;;  %v7255_v32 = vld [vmem:[#allocation97_spill] sm:$0xff] }
 0x248   : > { %3928 = vst.msk [vmem:[%s6483_s29 + $0x80] sm:$0xff] %vm3911_vm1, %v3895_v60  ;;  %v3898_v14 = vmul.f32 %v3804_v27, %v7224_v5  ;;  %v3798_v35 = vadd.f32 %v3797_v4, %v3540_v6  ;;  %v3558_v39 = vadd.f32 %v4945_v13, %v3278_v57  ;;  %v7244_v60 = vld [vmem:[#allocation55_spill] sm:$0xff]  ;;  %v7246_v13 = vld [vmem:[#allocation108_spill] sm:$0xff] }
 0x249   : > { %v3551_v42 = vpop.f32.mrf.mxu0  ;;  %v5001_v33 = vpop.f32.mrf.mxu1  ;;  %v3342_v18 = vadd.f32 %v7249_v10, %v3022_v12  ;;  %v7263_v12 = vld [vmem:[#allocation89_spill] sm:$0xff] }
 0x24a   : > { %3931 = vst.msk [vmem:[%s6483_s29 + $0x98] sm:$0xff] %vm3911_vm1, %v3898_v14  ;;  %v3897_v54 = vmul.f32 %v3798_v35, %v7228_v9  ;;  %v3816_v3 = vadd.f32 %v4995_v19, %v3558_v39  ;;  %v3552_v41 = vadd.f32 %v3551_v42, %v3270_v0  ;;  %v7234_v19 = vld [vmem:[#allocation33_spill] sm:$0xff]  ;;  %v7245_v0 = vld [vmem:[#allocation35_spill] sm:$0xff]  ;;  %v7248_v14 = vld [vmem:[#allocation62_spill] sm:$0xff] }
 0x24b   : > { %v4948_v43 = vpop.f32.mrf.mxu0  ;;  %v3833_v4 = vpop.f32.mrf.mxu1  ;;  %v3008_v17 = vadd.f32 %v7235_v2, %v7234_v19  ;;  %v3015_v61 = vadd.f32 %v7246_v13, %v7245_v0  ;;  %v7252_v9 = vld [vmem:[#allocation65_spill] sm:$0xff] }
 0x24c   : > { %3930 = vst.msk [vmem:[%s6483_s29 + $0x90] sm:$0xff] %vm3911_vm1, %v3897_v54  ;;  %v3900_v28 = vmul.f32 %v3816_v3, %v7232_v23  ;;  %v3810_v24 = vadd.f32 %v3809_v46, %v3552_v41  ;;  %v3570_v8 = vadd.f32 %v4948_v43, %v3294_v56  ;;  %v7238_v46 = vld [vmem:[#allocation12_spill] sm:$0xff] }
 0x24d   : > { %v3563_v50 = vpop.f32.mrf.mxu0  ;;  %v5004_v25 = vpop.f32.mrf.mxu1  ;;  %v3001_v29 = vadd.f32 %v7239_v22, %v7238_v46  ;;  %v3334_v37 = vadd.f32 %v7253_v45, %v3015_v61  ;;  %v7256_v23 = vld [vmem:[#allocation68_spill] sm:$0xff]  ;;  %v7261_v22 = vld [vmem:[#allocation82_spill] sm:$0xff] }
 0x24e   : > { %3933 = vst.msk [vmem:[%s6483_s29 + $0xa8] sm:$0xff] %vm3911_vm1, %v3900_v28  ;;  %v3899_v11 = vmul.f32 %v3810_v24, %v7236_v26  ;;  %v3828_v47 = vadd.f32 %v4998_v51, %v3570_v8  ;;  %v3564_v53 = vadd.f32 %v3563_v50, %v3286_v63  ;;  %v7243_v51 = vld [vmem:[#allocation70_spill] sm:$0xff] }
 0x24f   : > { %v4951_v21 = vpop.f32.mrf.mxu0  ;;  %v3845_v31 = vpop.f32.mrf.mxu1  ;;  %v3326_v49 = vadd.f32 %v7243_v51, %v3008_v17 }
 0x250   : > { %3932 = vst.msk [vmem:[%s6483_s29 + $0xa0] sm:$0xff] %vm3911_vm1, %v3899_v11  ;;  %v3902_v30 = vmul.f32 %v3828_v47, %v7240_v38  ;;  %v3822_v15 = vadd.f32 %v3821_v55, %v3564_v53  ;;  %v3582_v57 = vadd.f32 %v4951_v21, %v3310_v59  ;;  %v7247_v55 = vld [vmem:[#allocation93_spill] sm:$0xff] }
 0x251   : > { %v3575_v16 = vpop.f32.mrf.mxu0  ;;  %v5007_v48 = vpop.f32.mrf.mxu1  ;;  %v3318_v5 = vadd.f32 %v7247_v55, %v3001_v29  ;;  %v7257_v59 = vld [vmem:[#allocation85_spill] sm:$0xff] }
 0x252   : > { %3935 = vst.msk [vmem:[%s6483_s29 + $0xb8] sm:$0xff] %vm3911_vm1, %v3902_v30  ;;  %v3901_v27 = vmul.f32 %v3822_v15, %v7244_v60  ;;  %v3840_v6 = vadd.f32 %v5001_v33, %v3582_v57  ;;  %v3576_v36 = vadd.f32 %v3575_v16, %v3302_v58  ;;  %v7251_v33 = vld [vmem:[#allocation95_spill] sm:$0xff]  ;;  %v7259_v47 = vld [vmem:[#allocation105_spill] sm:$0xff]  ;;  %v7262_v57 = vld [vmem:[#allocation86_spill] sm:$0xff] }
 0x253   : > { %v4954_v62 = vpop.f32.mrf.mxu0  ;;  %v3036_v56 = vadd.f32 %v7251_v33, %v7250_v34  ;;  %v3857_v43 = vpop.f32.mrf.mxu1 }
 0x254   : > { %3934 = vst.msk [vmem:[%s6483_s29 + $0xb0] sm:$0xff] %vm3911_vm1, %v3901_v27  ;;  %v3904_v35 = vmul.f32 %v3840_v6, %v7248_v14  ;;  %v3834_v39 = vadd.f32 %v3833_v4, %v3576_v36  ;;  %v3594_v40 = vadd.f32 %v4954_v62, %v3326_v49  ;;  %v7254_v4 = vld [vmem:[#allocation26_spill] sm:$0xff] }
 0x255   : > { %v3587_v42 = vpop.f32.mrf.mxu0  ;;  %v3029_v63 = vadd.f32 %v7255_v32, %v7254_v4  ;;  %v3358_v50 = vadd.f32 %v7257_v59, %v3036_v56  ;;  %v5010_v11 = vpop.f32.mrf.mxu1 }
 0x256   : > { %3937 = vst.msk [vmem:[%s6483_s29 + $0xc8] sm:$0xff] %vm3911_vm1, %v3904_v35  ;;  %v3903_v54 = vmul.f32 %v3834_v39, %v7252_v9  ;;  %v3852_v3 = vadd.f32 %v5004_v25, %v3594_v40  ;;  %v3588_v41 = vadd.f32 %v3587_v42, %v3318_v5  ;;  %v7258_v25 = vld [vmem:[#allocation74_spill] sm:$0xff] }
 0x257   : > { %v4957_v1 = vpop.f32.mrf.mxu0  ;;  %v3350_v53 = vadd.f32 %v7259_v47, %v3029_v63  ;;  %v3869_v15 = vpop.f32.mrf.mxu1 }
 0x258   : > { %3936 = vst.msk [vmem:[%s6483_s29 + $0xc0] sm:$0xff] %vm3911_vm1, %v3903_v54  ;;  %v3906_v28 = vmul.f32 %v3852_v3, %v7256_v23  ;;  %v3846_v24 = vadd.f32 %v3845_v31, %v3588_v41  ;;  %v3606_v8 = vadd.f32 %v4957_v1, %v3342_v18 }
 0x259   : > { %v3599_v52 = vpop.f32.mrf.mxu0 }
 0x25a   : > { %3939 = vst.msk [vmem:[%s6483_s29 + $0xd8] sm:$0xff] %vm3911_vm1, %v3906_v28  ;;  %v3905_v19 = vmul.f32 %v3846_v24, %v7258_v25  ;;  %v3864_v2 = vadd.f32 %v5007_v48, %v3606_v8  ;;  %v3600_v17 = vadd.f32 %v3599_v52, %v3334_v37 }
 0x25b   : > { %v4960_v26 = vpop.f32.mrf.mxu0 }
 0x25c   : > { %3938 = vst.msk [vmem:[%s6483_s29 + $0xd0] sm:$0xff] %vm3911_vm1, %v3905_v19  ;;  %v3908_v58 = vmul.f32 %v3864_v2, %v7260_v44  ;;  %v3858_v21 = vadd.f32 %v3857_v43, %v3600_v17  ;;  %v3618_v31 = vadd.f32 %v4960_v26, %v3358_v50 }
 0x25d   : > { %v3611_v46 = vpop.f32.mrf.mxu0 }
 0x25e   : > { %3941 = vst.msk [vmem:[%s6483_s29 + $0xe8] sm:$0xff] %vm3911_vm1, %v3908_v58  ;;  %v3907_v29 = vmul.f32 %v3858_v21, %v7261_v22  ;;  %v3876_v38 = vadd.f32 %v5010_v11, %v3618_v31  ;;  %v3612_v30 = vadd.f32 %v3611_v46, %v3350_v53 }
 0x260   : > { %3940 = vst.msk [vmem:[%s6483_s29 + $0xe0] sm:$0xff] %vm3911_vm1, %v3907_v29  ;;  %v3910_v7 = vmul.f32 %v3876_v38, %v7262_v57  ;;  %v3870_v20 = vadd.f32 %v3869_v15, %v3612_v30 }
 0x262   : > { %3943 = vst.msk [vmem:[%s6483_s29 + $0xf8] sm:$0xff] %vm3911_vm1, %v3910_v7  ;;  %v3909_v16 = vmul.f32 %v3870_v20, %v7263_v12 }
 0x264   : > { %3942 = vst.msk [vmem:[%s6483_s29 + $0xf0] sm:$0xff] %vm3911_vm1, %v3909_v16 }
 0x265 PF: > { %s13_s12 = sadd.s32 1, %s5025_s12  }
 0x266   : > { %p10_p4 = scmp.ge.s32.totalorder %s13_s12, 10  }
 0x268   :  { %12 = sbr.rel (!%p10_p4) target bundleno = 1 (0x1), region = 64 }

</bundles_post_ra>
